<compile_context>
chip_gen: v7x
topology: tpu7x:2x2x1
jax: 0.10.0
libtpu: 0.0.40
codegen_flags: <defaults>
</compile_context>

<pallas_src>
import math

import jax
import jax.numpy as jnp
from jax.experimental import pallas as pl
from jax.experimental.pallas import tpu as pltpu


_DEFAULT_VMEM_BUDGET = 20 * 1024 * 1024   # per-block working-set budget (bytes)
_VMEM_LIMIT_BYTES = 48 * 1024 * 1024      # scoped VMEM limit (v5e/v6e/v7x safe)


def _context_attention_kernel(ref_ref, ctx_ref, wr_t_ref, wc_t_ref,
                              wh_big_ref, bias_ref, wa_ref,
                              out_ref, alpha_ref):
    """One grid step == one block of BB batch rows (flattened into 2-D slabs).

    ref_ref    : (BB*T, H)     reference slab, compute dtype (bf16)
    ctx_ref    : (BB*Tc, G)    context slab, compute dtype (bf16)
    wr_t_ref   : (H, Ap)       reference_projection weight^T, A zero-padded to Ap
    wc_t_ref   : (G, Ap)       context_projection weight^T, zero-padded
    wh_big_ref : (BB*T, BB*Tc) block-diagonal context_hidden_projection weight
    bias_ref   : (BB*T, Ap)    folded bias (br + rowsum(Wh)*bc + bh), tiled, f32
    wa_ref     : (Ap, 1)       alpha_projection weight with 1/temperature folded, f32
    out_ref    : (BB, H)       attention-filtered reference (summed over T)
    alpha_ref  : (BB, T)       attention weights
    """
    BB, T = alpha_ref.shape
    rows_r, H = ref_ref.shape
    f32 = jnp.float32

    ref2 = ref_ref[...]                                    # (BB*T, H)  bf16
    ctx2 = ctx_ref[...]                                    # (BB*Tc, G) bf16

    # reference / context projections: batch folded into the MXU M dimension,
    # bf16 operands, f32 accumulation.
    ref_att = jnp.dot(ref2, wr_t_ref[...], preferred_element_type=f32)    # (BB*T, Ap)
    ctx_proj = jnp.dot(ctx2, wc_t_ref[...], preferred_element_type=f32)   # (BB*Tc, Ap)

    # context_hidden_projection for the whole batch block as ONE dense matmul
    # against the precomputed block-diagonal weight (no broadcast_to, no
    # per-batch (T,Tc)x(Tc,A) matvecs).
    ctx_att = jnp.dot(wh_big_ref[...], ctx_proj.astype(wh_big_ref.dtype),
                      preferred_element_type=f32)                          # (BB*T, Ap)

    # All biases pre-folded into bias_ref; padded A columns are exactly zero.
    pre = jnp.tanh(ref_att + ctx_att + bias_ref[...])                      # (BB*T, Ap)

    # alpha_projection (1/temperature folded into wa): one matmul, batch in M.
    e_col = jnp.dot(pre, wa_ref[...], preferred_element_type=f32)          # (BB*T, 1)
    # Tiny relayout (BB*T scalars) so T sits on the lane axis for the softmax
    # and the (BB, T) alpha output.
    e = e_col.reshape(BB, T)

    # Numerically-stable softmax over T with EXACT normalization
    # (alphas sum to 1 at f32 precision).
    m = jnp.max(e, axis=-1, keepdims=True)                                 # (BB, 1)
    p = jnp.exp(e - m)                                                     # (BB, T)
    denom = jnp.sum(p, axis=-1, keepdims=True)                             # (BB, 1)
    alphas = p / denom                                                     # (BB, T) f32
    alpha_ref[...] = alphas.astype(alpha_ref.dtype)

    # output = sum_T (reference * alphas)  (average_seq=True path):
    # VPU multiply + sublane reduce (cheaper than an M=1 batched MXU matmul
    # for small T).  The reshape of alphas back to column layout is another
    # tiny BB*T-scalar relayout.
    weighted = ref2 * alphas.reshape(rows_r, 1).astype(ref2.dtype)         # (BB*T, H)
    out_ref[...] = jnp.sum(weighted.reshape(BB, T, H), axis=1,
                           dtype=f32).astype(out_ref.dtype)


def _vmem_block_bytes(bb, T, H, Tc, G, Ap, in_itemsize):
    """Rough per-block VMEM working set: double-buffered inputs/outputs,
    resident weights (incl. the block-diagonal Wh), and f32 intermediates."""
    rows_r, rows_c = bb * T, bb * Tc
    nbytes = 2 * rows_r * H * in_itemsize            # reference slab (x2 buffers)
    nbytes += 2 * rows_c * G * in_itemsize           # context slab (x2 buffers)
    nbytes += (H + G) * Ap * in_itemsize             # wr_t, wc_t (resident)
    nbytes += rows_r * rows_c * in_itemsize          # block-diagonal Wh (resident)
    nbytes += rows_r * Ap * 4 + Ap * 4               # folded bias + wa (f32)
    nbytes += 2 * (bb * H + bb * T) * 4              # output blocks (x2 buffers)
    nbytes += (3 * rows_r + rows_c) * Ap * 4         # ref_att/ctx_att/pre + ctx_proj
    nbytes += rows_r * H * in_itemsize               # weighted reference
    return nbytes


def _round_block(B, bb):
    """Clamp the batch block: a single block, or a multiple of 8 so every 2-D
    block's sublane dim (BB*T, BB*Tc, BB) is 8-divisible and output stores are
    unmasked."""
    bb = max(1, min(int(bb), B))
    if bb >= B:
        return B
    bb8 = (bb // 8) * 8
    if bb8 == 0:
        return B if B <= 8 else 8
    return bb8


def _pick_block_b(B, T, H, Tc, G, Ap, in_itemsize,
                  budget_bytes=_DEFAULT_VMEM_BUDGET):
    """Target ~512 fused matmul rows per block; shrink (by halving) until the
    whole VMEM working set fits the budget.  No forced >=2-step split."""
    bb = min(B, max(1, pl.cdiv(512, max(1, T))))
    while bb > 8 and _vmem_block_bytes(bb, T, H, Tc, G, Ap, in_itemsize) > budget_bytes:
        bb = pl.cdiv(bb, 2)
    return _round_block(B, bb)


def context_attention_v2(reference, context, params, temperature=1.0,
                         block_b=None, compute_dtype=jnp.bfloat16):
    """Pallas-backed forward pass. Returns (output (B, H), alphas (B, T)).

    The heavy operands (reference, context, projection weights) go through the
    MXU in `compute_dtype` (bf16 by default) with f32 accumulation; the tanh /
    softmax / normalization path stays in f32.
    """
    reference = jnp.asarray(reference)
    context = jnp.asarray(context)
    B, T, H = reference.shape
    Bc, Tc, G = context.shape
    assert Bc == B, "reference / context batch mismatch"
    f32 = jnp.float32
    cdt = jnp.dtype(compute_dtype)

    # ---- parameter preprocessing (once, outside the kernel) ----------------
    wr = jnp.asarray(params["wr"], f32)               # (A, H)
    wc = jnp.asarray(params["wc"], f32)               # (A, G)
    wh = jnp.asarray(params["wh"], f32)               # (T, Tc)
    wa = jnp.asarray(params["wa"], f32).reshape(-1)   # (A,)
    br = jnp.asarray(params["br"], f32)               # (A,)
    bc = jnp.asarray(params["bc"], f32)               # (A,)
    bh = jnp.asarray(params["bh"], f32)               # (T,)
    A = wr.shape[0]
    Ap = ((A + 127) // 128) * 128                     # lane-pad attention size (exact)

    wr_t = jnp.zeros((H, Ap), f32).at[:, :A].set(wr.T).astype(cdt)        # (H, Ap)
    wc_t = jnp.zeros((G, Ap), f32).at[:, :A].set(wc.T).astype(cdt)        # (G, Ap)
    # Fold 1/temperature into the alpha-projection weight (exact by linearity).
    wa_col = jnp.zeros((Ap, 1), f32).at[:A, 0].set(wa / jnp.float32(temperature))
    # Fold all biases into a single (T, A) term:
    #   Wh (X Wc^T + 1 bc^T) + bh 1^T = Wh X Wc^T + rowsum(Wh) bc^T + bh 1^T, plus br.
    bias = (br[None, :] + wh.sum(axis=1, keepdims=True) * bc[None, :]
            + bh[:, None])                                                 # (T, A)
    bias_pad = jnp.zeros((T, Ap), f32).at[:, :A].set(bias)

    # ---- batch blocking -----------------------------------------------------
    if block_b is None:
        BB = _pick_block_b(B, T, H, Tc, G, Ap, cdt.itemsize)
    else:
        BB = _round_block(B, block_b)
    nb = pl.cdiv(B, BB)
    Bp = nb * BB
    if Bp != B:
        pad = Bp - B
        reference = jnp.pad(reference, ((0, pad), (0, 0), (0, 0)))
        context = jnp.pad(context, ((0, pad), (0, 0), (0, 0)))

    # Flatten batch/time into lane-dense 2-D slabs; cast MXU operands to bf16.
    ref2 = reference.reshape(Bp * T, H).astype(cdt)
    ctx2 = context.reshape(Bp * Tc, G).astype(cdt)
    # Block-diagonal context_hidden_projection weight (one per batch block, resident).
    wh_big = jnp.kron(jnp.eye(BB, dtype=f32), wh).astype(cdt)              # (BB*T, BB*Tc)
    # Folded bias tiled over the batch rows of one block (resident, f32).
    bias_blk = jnp.tile(bias_pad, (BB, 1))                                 # (BB*T, Ap)

    out2, al2 = pl.pallas_call(
        _context_attention_kernel,
        out_shape=(
            jax.ShapeDtypeStruct((Bp, H), f32),
            jax.ShapeDtypeStruct((Bp, T), f32),
        ),
        grid_spec=pltpu.PrefetchScalarGridSpec(
            num_scalar_prefetch=0,
            grid=(nb,),
            in_specs=[
                pl.BlockSpec((BB * T, H), lambda b: (b, 0)),        # reference slab
                pl.BlockSpec((BB * Tc, G), lambda b: (b, 0)),       # context slab
                pl.BlockSpec((H, Ap), lambda b: (0, 0)),            # wr_t  (resident)
                pl.BlockSpec((G, Ap), lambda b: (0, 0)),            # wc_t  (resident)
                pl.BlockSpec((BB * T, BB * Tc), lambda b: (0, 0)),  # block-diag Wh
                pl.BlockSpec((BB * T, Ap), lambda b: (0, 0)),       # folded bias
                pl.BlockSpec((Ap, 1), lambda b: (0, 0)),            # wa / temperature
            ],
            out_specs=[
                pl.BlockSpec((BB, H), lambda b: (b, 0)),
                pl.BlockSpec((BB, T), lambda b: (b, 0)),
            ],
        ),
        compiler_params=pltpu.CompilerParams(
            dimension_semantics=("parallel",),
            vmem_limit_bytes=_VMEM_LIMIT_BYTES),
    )(ref2, ctx2, wr_t, wc_t, wh_big, bias_blk, wa_col)

    # Drop any batch padding (free XLA slices).
    return out2[:B], al2[:B]


# ----------------------------- test harness ---------------------------------

def _linear_init(key, out_features, in_features, bias=True):
    """Deterministic emulation of nn.Linear default init: U(-1/sqrt(fan_in), +...)."""
    kw, kb = jax.random.split(key)
    bound = 1.0 / math.sqrt(in_features)
    w = jax.random.uniform(kw, (out_features, in_features), jnp.float32, -bound, bound)
    b = (jax.random.uniform(kb, (out_features,), jnp.float32, -bound, bound)
         if bias else None)
    return w, b


def _reference_forward(reference, context, params, temperature):
    """Pure-JAX f32 reference (mirrors the PyTorch forward) for correctness check."""
    ref_att = jnp.einsum("bth,ah->bta", reference, params["wr"]) + params["br"]
    ctx_proj = jnp.einsum("bcg,ag->bca", context, params["wc"]) + params["bc"]
    ctx_att = (jnp.einsum("tc,bca->bta", params["wh"], ctx_proj)
               + params["bh"][None, :, None])
    e = jnp.einsum("bta,a->bt", jnp.tanh(ref_att + ctx_att), params["wa"][0]) / temperature
    alphas = jax.nn.softmax(e, axis=1)
    out = jnp.einsum("bth,bt->bh", reference, alphas)
    return out, alphas


def _run_case(seed, B, T, H, Tc, G, A, temperature, block_b=None):
    root = jax.random.PRNGKey(seed)
    k_ref, k_ctx, k1, k2, k3, k4 = jax.random.split(root, 6)

    reference = jax.random.normal(k_ref, (B, T, H), jnp.float32)
    context = jax.random.normal(k_ctx, (B, Tc, G), jnp.float32)

    wr, br = _linear_init(k1, A, H)             # reference_projection
    wc, bc = _linear_init(k2, A, G)             # context_projection
    wh, bh = _linear_init(k3, T, Tc)            # context_hidden_projection
    wa, _ = _linear_init(k4, 1, A, bias=False)  # alpha_projection (no bias)
    params = {"wr": wr, "br": br, "wc": wc, "bc": bc, "wh": wh, "bh": bh, "wa": wa}

    out, alphas = context_attention_v2(reference, context, params, temperature,
                                       block_b=block_b)
    out = jax.block_until_ready(out)
    alphas = jax.block_until_ready(alphas)

    out_ref, alphas_ref = _reference_forward(reference, context, params, temperature)
    assert out.shape == (B, H) and alphas.shape == (B, T)
    # bf16 MXU operands with f32 accumulation -> tolerances looser than pure f32.
    assert jnp.allclose(out, out_ref, atol=5e-2, rtol=5e-2), \
        float(jnp.max(jnp.abs(out - out_ref)))
    assert jnp.allclose(alphas, alphas_ref, atol=2e-2, rtol=2e-2), \
        float(jnp.max(jnp.abs(alphas - alphas_ref)))
    # Exact softmax normalization: attention weights sum to 1.
    assert jnp.allclose(jnp.sum(alphas, axis=1), 1.0, atol=1e-3)


if __name__ == "__main__":
    # Case 1: default block picking (single large block, BB = B).
    _run_case(seed=0, B=16, T=8, H=32, Tc=8, G=16, A=16, temperature=1.0)
    # Case 2: small odd batch, non-unit temperature, different hidden sizes.
    _run_case(seed=1, B=5, T=8, H=64, Tc=8, G=24, A=16, temperature=2.0)
    # Case 3: forced multi-block grid with batch padding (B=13 -> 2 blocks of 8).
    _run_case(seed=2, B=13, T=8, H=32, Tc=8, G=16, A=16, temperature=1.0, block_b=8)
    print("KERNEL_OK")
</pallas_src>

<mosaic_0001>
module attributes {stable_mosaic.version = 11 : i64} {
  func.func @_context_attention_kernel(%arg0: i32, %arg1: memref<128x32xbf16, #tpu.memory_space<vmem>>, %arg2: memref<128x16xbf16, #tpu.memory_space<vmem>>, %arg3: memref<32x128xbf16, #tpu.memory_space<vmem>>, %arg4: memref<16x128xbf16, #tpu.memory_space<vmem>>, %arg5: memref<128x128xbf16, #tpu.memory_space<vmem>>, %arg6: memref<128x128xf32, #tpu.memory_space<vmem>>, %arg7: memref<128x1xf32, #tpu.memory_space<vmem>>, %arg8: memref<16x32xf32, #tpu.memory_space<vmem>>, %arg9: memref<16x8xf32, #tpu.memory_space<vmem>>) attributes {dimension_semantics = [#tpu.dimension_semantics<parallel>], iteration_bounds = array<i64: 1>, scalar_prefetch = 0 : i64, scratch_operands = 0 : i64, tpu.core_type = #tpu.core_type<tc>, window_params = [{transform_indices = @transform_0, window_bounds = array<i64: 128, 32>}, {transform_indices = @transform_1, window_bounds = array<i64: 128, 16>}, {pipeline_mode = #tpu.pipeline_mode<synchronous>, transform_indices = @transform_2, window_bounds = array<i64: 32, 128>}, {pipeline_mode = #tpu.pipeline_mode<synchronous>, transform_indices = @transform_3, window_bounds = array<i64: 16, 128>}, {pipeline_mode = #tpu.pipeline_mode<synchronous>, transform_indices = @transform_4, window_bounds = array<i64: 128, 128>}, {pipeline_mode = #tpu.pipeline_mode<synchronous>, transform_indices = @transform_5, window_bounds = array<i64: 128, 128>}, {pipeline_mode = #tpu.pipeline_mode<synchronous>, transform_indices = @transform_6, window_bounds = array<i64: 128, 1>}, {transform_indices = @transform_7, window_bounds = array<i64: 16, 32>}, {transform_indices = @transform_8, window_bounds = array<i64: 16, 8>}]} {
    %c0 = arith.constant 0 : index
    %c0_0 = arith.constant 0 : index
    %0 = vector.load %arg1[%c0, %c0_0] : memref<128x32xbf16, #tpu.memory_space<vmem>>, vector<128x32xbf16>
    %c0_1 = arith.constant 0 : index
    %c0_2 = arith.constant 0 : index
    %1 = vector.load %arg2[%c0_1, %c0_2] : memref<128x16xbf16, #tpu.memory_space<vmem>>, vector<128x16xbf16>
    %c0_3 = arith.constant 0 : index
    %c0_4 = arith.constant 0 : index
    %2 = vector.load %arg3[%c0_3, %c0_4] : memref<32x128xbf16, #tpu.memory_space<vmem>>, vector<32x128xbf16>
    %cst = arith.constant dense<0.000000e+00> : vector<128x128xf32>
    %3 = tpu.matmul %0, %2, %cst {dimension_numbers = #tpu.dot_dimension_numbers<[1], [0], [0], [1], [0, 0, 1, 1], [], []>} : vector<128x32xbf16>, vector<32x128xbf16>, vector<128x128xf32> -> vector<128x128xf32>
    %c0_5 = arith.constant 0 : index
    %c0_6 = arith.constant 0 : index
    %4 = vector.load %arg4[%c0_5, %c0_6] : memref<16x128xbf16, #tpu.memory_space<vmem>>, vector<16x128xbf16>
    %cst_7 = arith.constant dense<0.000000e+00> : vector<128x128xf32>
    %5 = tpu.matmul %1, %4, %cst_7 {dimension_numbers = #tpu.dot_dimension_numbers<[1], [0], [0], [1], [0, 0, 1, 1], [], []>} : vector<128x16xbf16>, vector<16x128xbf16>, vector<128x128xf32> -> vector<128x128xf32>
    %c0_8 = arith.constant 0 : index
    %c0_9 = arith.constant 0 : index
    %6 = vector.load %arg5[%c0_8, %c0_9] : memref<128x128xbf16, #tpu.memory_space<vmem>>, vector<128x128xbf16>
    %7 = arith.truncf %5 : vector<128x128xf32> to vector<128x128xbf16>
    %cst_10 = arith.constant dense<0.000000e+00> : vector<128x128xf32>
    %8 = tpu.matmul %6, %7, %cst_10 {dimension_numbers = #tpu.dot_dimension_numbers<[1], [0], [0], [1], [0, 0, 1, 1], [], []>} : vector<128x128xbf16>, vector<128x128xbf16>, vector<128x128xf32> -> vector<128x128xf32>
    %9 = arith.addf %3, %8 : vector<128x128xf32>
    %c0_11 = arith.constant 0 : index
    %c0_12 = arith.constant 0 : index
    %10 = vector.load %arg6[%c0_11, %c0_12] : memref<128x128xf32, #tpu.memory_space<vmem>>, vector<128x128xf32>
    %11 = arith.addf %9, %10 : vector<128x128xf32>
    %12 = math.tanh %11 : vector<128x128xf32>
    %c0_13 = arith.constant 0 : index
    %c0_14 = arith.constant 0 : index
    %13 = vector.load %arg7[%c0_13, %c0_14] : memref<128x1xf32, #tpu.memory_space<vmem>>, vector<128x1xf32>
    %cst_15 = arith.constant dense<0.000000e+00> : vector<128x1xf32>
    %14 = tpu.matmul %12, %13, %cst_15 {dimension_numbers = #tpu.dot_dimension_numbers<[1], [0], [0], [1], [0, 0, 1, 1], [], []>} : vector<128x128xf32>, vector<128x1xf32>, vector<128x1xf32> -> vector<128x1xf32>
    %15 = vector.shape_cast %14 : vector<128x1xf32> to vector<16x8xf32>
    %cst_16 = arith.constant dense<0xFF800000> : vector<16xf32>
    %16 = vector.multi_reduction <maximumf>, %15, %cst_16 [1] : vector<16x8xf32> to vector<16xf32>
    %17 = vector.shape_cast %16 : vector<16xf32> to vector<16x1xf32>
    %18 = vector.broadcast %17 : vector<16x1xf32> to vector<16x8xf32>
    %19 = arith.subf %15, %18 : vector<16x8xf32>
    %20 = math.exp %19 : vector<16x8xf32>
    %cst_17 = arith.constant dense<0.000000e+00> : vector<16xf32>
    %21 = vector.multi_reduction <add>, %20, %cst_17 [1] : vector<16x8xf32> to vector<16xf32>
    %22 = vector.shape_cast %21 : vector<16xf32> to vector<16x1xf32>
    %23 = vector.broadcast %22 : vector<16x1xf32> to vector<16x8xf32>
    %24 = arith.divf %20, %23 : vector<16x8xf32>
    %c0_18 = arith.constant 0 : index
    %c0_19 = arith.constant 0 : index
    %25 = vector.load %arg9[%c0_18, %c0_19] : memref<16x8xf32, #tpu.memory_space<vmem>>, vector<16x8xf32>
    tpu.vector_store %arg9[%c0_18, %c0_19], %24 {strides = array<i32>} : memref<16x8xf32, #tpu.memory_space<vmem>>, vector<16x8xf32>,
    %26 = vector.shape_cast %24 : vector<16x8xf32> to vector<128x1xf32>
    %27 = arith.truncf %26 : vector<128x1xf32> to vector<128x1xbf16>
    %28 = vector.broadcast %27 : vector<128x1xbf16> to vector<128x32xbf16>
    %29 = arith.mulf %0, %28 : vector<128x32xbf16>
    %30 = vector.shape_cast %29 : vector<128x32xbf16> to vector<16x8x32xbf16>
    %31 = arith.extf %30 : vector<16x8x32xbf16> to vector<16x8x32xf32>
    %cst_20 = arith.constant dense<0.000000e+00> : vector<16x32xf32>
    %32 = vector.multi_reduction <add>, %31, %cst_20 [1] : vector<16x8x32xf32> to vector<16x32xf32>
    %c0_21 = arith.constant 0 : index
    %c0_22 = arith.constant 0 : index
    %33 = vector.load %arg8[%c0_21, %c0_22] : memref<16x32xf32, #tpu.memory_space<vmem>>, vector<16x32xf32>
    tpu.vector_store %arg8[%c0_21, %c0_22], %32 {strides = array<i32>} : memref<16x32xf32, #tpu.memory_space<vmem>>, vector<16x32xf32>,
    return
  }
  func.func @transform_0(%arg0: i32) -> (i32, i32) {
    %c0_i32 = arith.constant 0 : i32
    %c0_i32_0 = arith.constant 0 : i32
    return %arg0, %c0_i32 : i32, i32
  }
  func.func @transform_1(%arg0: i32) -> (i32, i32) {
    %c0_i32 = arith.constant 0 : i32
    %c0_i32_0 = arith.constant 0 : i32
    return %arg0, %c0_i32 : i32, i32
  }
  func.func @transform_2(%arg0: i32) -> (i32, i32) {
    %c0_i32 = arith.constant 0 : i32
    %c0_i32_0 = arith.constant 0 : i32
    %c0_i32_1 = arith.constant 0 : i32
    return %c0_i32, %c0_i32_0 : i32, i32
  }
  func.func @transform_3(%arg0: i32) -> (i32, i32) {
    %c0_i32 = arith.constant 0 : i32
    %c0_i32_0 = arith.constant 0 : i32
    %c0_i32_1 = arith.constant 0 : i32
    return %c0_i32, %c0_i32_0 : i32, i32
  }
  func.func @transform_4(%arg0: i32) -> (i32, i32) {
    %c0_i32 = arith.constant 0 : i32
    %c0_i32_0 = arith.constant 0 : i32
    %c0_i32_1 = arith.constant 0 : i32
    return %c0_i32, %c0_i32_0 : i32, i32
  }
  func.func @transform_5(%arg0: i32) -> (i32, i32) {
    %c0_i32 = arith.constant 0 : i32
    %c0_i32_0 = arith.constant 0 : i32
    %c0_i32_1 = arith.constant 0 : i32
    return %c0_i32, %c0_i32_0 : i32, i32
  }
  func.func @transform_6(%arg0: i32) -> (i32, i32) {
    %c0_i32 = arith.constant 0 : i32
    %c0_i32_0 = arith.constant 0 : i32
    %c0_i32_1 = arith.constant 0 : i32
    return %c0_i32, %c0_i32_0 : i32, i32
  }
  func.func @transform_7(%arg0: i32) -> (i32, i32) {
    %c0_i32 = arith.constant 0 : i32
    %c0_i32_0 = arith.constant 0 : i32
    return %arg0, %c0_i32 : i32, i32
  }
  func.func @transform_8(%arg0: i32) -> (i32, i32) {
    %c0_i32 = arith.constant 0 : i32
    %c0_i32_0 = arith.constant 0 : i32
    return %arg0, %c0_i32 : i32, i32
  }
}

</mosaic_0001>

<bundles_post_ra>
// kernel: tpu_custom_call.1
= control target key start
LH: loop header
LB: loop body
LE: loop exit
PB: predicated region body
PF: predicated region fallthrough
CT: control target
= control target key end

     0   :  { %vm114_vm0 = vcmask 130048   ;;  %s3037_s0 = inlined_call_operand.vmem [shape: bf16[128,32], index: 0, kind: input, shape index: {}]   ;;  %s3038_s1 = inlined_call_operand.vmem [shape: bf16[128,16], index: 1, kind: input, shape index: {}]   ;;  %s3039_s2 = inlined_call_operand.vmem [shape: bf16[32,128], index: 2, kind: input, shape index: {}]   ;;  %s3040_s3 = inlined_call_operand.vmem [shape: bf16[16,128], index: 3, kind: input, shape index: {}]   ;;  %s3041_s4 = inlined_call_operand.vmem [shape: bf16[128,128], index: 4, kind: input, shape index: {}]   ;;  %s3042_s5 = inlined_call_operand.vmem [shape: f32[128,128], index: 5, kind: input, shape index: {}]   ;;  %s3043_s6 = inlined_call_operand.vmem [shape: f32[128,1], index: 6, kind: input, shape index: {}]   ;;  %s3044_s7 = inlined_call_operand.hbm [shape: f32[16,32], index: 7, kind: output, shape index: {0}]   ;;  %s3045_s8 = inlined_call_operand.vmem [shape: f32[16,8], index: 8, kind: output, shape index: {1}]  }
   0x1   :  { %v2154_v0 = vld [vmem:[%s3040_s3] sm:$0xff]   ;;  %v2156_v2 = vld [vmem:[%s3038_s1 + $0x8] sm:$0xff]   ;;  %v2157_v3 = vld [vmem:[%s3038_s1 + $0x10] sm:$0xff]  }
   0x2   :  { %v2155_v1 = vld [vmem:[%s3038_s1] sm:$0xff]   ;;  %1972 = vmatprep.subr.bf16.mxu0 %v2154_v0  ;;  %v2158_v4 = vld [vmem:[%s3038_s1 + $0x18] sm:$0xff]  }
   0x3   :  { %1973 = vmatpush3.bf16.msra.mxu0 %v2154_v0  ;;  %1974 = vmatprep.mubr.msk.bf16.mxu0 %vm114_vm0, %v2155_v1  ;;  %v2159_v5 = vld [vmem:[%s3038_s1 + $0x20] sm:$0xff]  }
   0x6   :  { %1975 = vmatmul.mubr.msk.bf16.vlgmr.msra.gmra.mrb[0].mxu0 %vm114_vm0, %v2156_v2 }
   0x7   :  { %1978 = vmatprep.mubr.msk.bf16.mxu0 %vm114_vm0, %v2157_v3 }
   0xe   :  { %1979 = vmatmul.mubr.msk.bf16.gmra.mrb[4].mxu0 %vm114_vm0, %v2158_v4 }
   0xf   :  { %1982 = vmatprep.mubr.msk.bf16.mxu0 %vm114_vm0, %v2159_v5 }
  0x10   :  { %14 = vsyncpa [#allocation3], 0  ;;  %v2160_v6 = vld [vmem:[%s3038_s1 + $0x28] sm:$0xff]   ;;  %v2161_v7 = vld [vmem:[%s3038_s1 + $0x30] sm:$0xff]   ;;  %vm457_vm1 = vcmask 261120   ;;  %vm918_vm2 = vcmask 1041409  }
  0x11   :  { %v2162_v8 = vld [vmem:[%s3038_s1 + $0x38] sm:$0xff]   ;;  %v2163_v9 = vld [vmem:[%s3041_s4] sm:$0xff]   ;;  %v628_v11 = vld [vmem:[%s3043_s6 + $0x8] sm:$0xff]  ;;  %vm920_vm3 = vcmask 1042434   ;;  %vm922_vm4 = vcmask 1043459   ;;  %vm924_vm5 = vcmask 1044484  }
  0x12   :  { %2006 = vmatprep.mubr.bf16.mxu1 %v2163_v9  ;;  %v627_v10 = vld [vmem:[%s3043_s6] sm:$0xff]  ;;  %v629_v12 = vld [vmem:[%s3043_s6 + $0x10] sm:$0xff]  ;;  %v630_v14 = vld [vmem:[%s3043_s6 + $0x18] sm:$0xff]  ;;  %vm926_vm6 = vcmask 1045509   ;;  %vm928_vm7 = vcmask 1046534   ;;  %vm930_vm8 = vcmask 1047559  }
  0x13   :  { %v2098_v13 = vpack.c.bf16 %v628_v11, %v627_v10  ;;  %v2102_v15 = vpack.c.bf16 %v630_v14, %v629_v12  ;;  %v631_v16 = vld [vmem:[%s3043_s6 + $0x20] sm:$0xff]  ;;  %v632_v17 = vld [vmem:[%s3043_s6 + $0x28] sm:$0xff]  ;;  %v633_v19 = vld [vmem:[%s3043_s6 + $0x30] sm:$0xff]  ;;  %vm941_vm9 = vcmask 64512   ;;  %s2320_s13 = smov [#allocation2]  }
  0x14   :  { %v2106_v18 = vpack.c.bf16 %v632_v17, %v631_v16  ;;  %v634_v20 = vld [vmem:[%s3043_s6 + $0x38] sm:$0xff]  ;;  %v2165_v46 = vld [vmem:[%s3039_s2] sm:$0xff]   ;;  %v2164_v47 = vld [vmem:[%s3041_s4 + $0x8] sm:$0xff]   ;;  %s1847_s14 = sshll.u32 %s2320_s13, 4  ;;  %s1848_s14 = int_to_ptr.vmem [resolvable:$true] %s1847_s14 }
  0x15   :  { %2099 = vmatprep.subr.bf16.mxu0 %v2098_v13  ;;  %v2110_v21 = vpack.c.bf16 %v634_v20, %v633_v19  ;;  %v2166_v48 = vld [vmem:[%s3041_s4 + $0x10] sm:$0xff]   ;;  %v2170_v49 = vld [vmem:[%s3039_s2 + $0x8] sm:$0xff]   ;;  %v2167_v50 = vld [vmem:[%s3041_s4 + $0x18] sm:$0xff]   ;;  %s2293_s17 = scalar_lea.vmem %s1848_s14, 256  ;;  %p2298_p1 = scmp.lt.s32.totalorder %s1848_s14, %s1848_s14 }
  0x16   :  { %1983 = vmatmul.mubr.msk.bf16.gmra.mrb[8].mxu0 %vm114_vm0, %v2160_v6  ;;  %v2168_v51 = vld [vmem:[%s3041_s4 + $0x20] sm:$0xff]   ;;  %v2169_v52 = vld [vmem:[%s3041_s4 + $0x28] sm:$0xff]   ;;  %v2171_v53 = vld [vmem:[%s3041_s4 + $0x30] sm:$0xff]   ;;  %p2294_p0 = scmp.ne.s32.totalorder %s1848_s14, %s2293_s17  ;;  %p2299_p2 = scmp.lt.s32.totalorder %s2293_s17, %s2293_s17 }
  0x17   :  { %1986 = vmatprep.mubr.msk.bf16.mxu0 %vm114_vm0, %v2161_v7  ;;  %2101 = vmatpush3.bf16.msra.mxu0 %v2098_v13  ;;  %v30_v54 = vld [vmem:[%s3037_s0] sm:$0xf]  ;;  %v31_v55 = vld [vmem:[%s3037_s0 + $0x4] sm:$0xf]  ;;  %v2172_v56 = vld [vmem:[%s3041_s4 + $0x38] sm:$0xff]  }
  0x18   :  { %2103 = vmatprep.subr.bf16.mxu0 %v2102_v15  ;;  %v1887_v57 = vcombine.low %v30_v54, %v31_v55  ;;  %v32_v58 = vld [vmem:[%s3037_s0 + $0x8] sm:$0xf]  ;;  %v33_v59 = vld [vmem:[%s3037_s0 + $0xc] sm:$0xf]  ;;  %v34_v60 = vld [vmem:[%s3037_s0 + $0x10] sm:$0xf]  ;;  %p2300_p3 = por %p2299_p2, %p2298_p1 }
  0x19   :  { %v35_v61 = vld [vmem:[%s3037_s0 + $0x14] sm:$0xf]  ;;  %v1888_v62 = vcombine.low %v32_v58, %v33_v59  ;;  %v36_v0 = vld [vmem:[%s3037_s0 + $0x18] sm:$0xf]  ;;  %v37_v1 = vld [vmem:[%s3037_s0 + $0x1c] sm:$0xf] }
  0x1a   :  { %v1889_v63 = vcombine.low %v34_v60, %v35_v61  ;;  %v38_v2 = vld [vmem:[%s3037_s0 + $0x20] sm:$0xf]  ;;  %v39_v3 = vld [vmem:[%s3037_s0 + $0x24] sm:$0xf]  ;;  %v1890_v4 = vcombine.low %v36_v0, %v37_v1  ;;  %v40_v6 = vld [vmem:[%s3037_s0 + $0x28] sm:$0xf]  ;;  %p2301_p4 = pnand %p2300_p3, %p2294_p0 }
  0x1b   :  { %2105 = vmatpush3.bf16.msra.mxu0 %v2102_v15  ;;  %v1891_v5 = vcombine.low %v38_v2, %v39_v3  ;;  %v41_v7 = vld [vmem:[%s3037_s0 + $0x2c] sm:$0xf]  ;;  %v43_v9 = vld [vmem:[%s3037_s0 + $0x34] sm:$0xf]  ;;  %v44_v12 = vld [vmem:[%s3037_s0 + $0x38] sm:$0xf] }
  0x1c   :  { %2107 = vmatprep.subr.bf16.mxu0 %v2106_v18  ;;  %v1892_v10 = vcombine.low %v40_v6, %v41_v7  ;;  %v45_v13 = vld [vmem:[%s3037_s0 + $0x3c] sm:$0xf]  ;;  %v635_v15 = vld [vmem:[%s3043_s6 + $0x40] sm:$0xff]  ;;  %v636_v16 = vld [vmem:[%s3043_s6 + $0x48] sm:$0xff] }
  0x1d   :  { %v1894_v14 = vcombine.low %v44_v12, %v45_v13  ;;  %v2114_v17 = vpack.c.bf16 %v636_v16, %v635_v15  ;;  %v638_v19 = vld [vmem:[%s3043_s6 + $0x58] sm:$0xff]  ;;  %v588_v59 = vld [vmem:[%s3042_s5 + $0x48] sm:$0xff] }
  0x1e   :  { %1987 = vmatmul.mubr.msk.bf16.gmra.mrb[12].mxu0 %vm114_vm0, %v2162_v8  ;;  %v42_v8 = vld [vmem:[%s3037_s0 + $0x30] sm:$0xf]  ;;  %v594_v15 = vld [vmem:[%s3042_s5 + $0x78] sm:$0xff] }
  0x1f   :  { %2109 = vmatpush3.bf16.msra.mxu0 %v2106_v18  ;;  %v1893_v11 = vcombine.low %v42_v8, %v43_v9  ;;  %v637_v18 = vld [vmem:[%s3043_s6 + $0x50] sm:$0xff] }
  0x20   :  { %2111 = vmatprep.subr.bf16.mxu0 %v2110_v21  ;;  %v2118_v20 = vpack.c.bf16 %v638_v19, %v637_v18  ;;  %v593_v8 = vld [vmem:[%s3042_s5 + $0x70] sm:$0xff] }
  0x23   :  { %2113 = vmatpush3.bf16.msra.mxu0 %v2110_v21  ;;  %v639_v21 = vld [vmem:[%s3043_s6 + $0x60] sm:$0xff] }
  0x24   :  { %2115 = vmatprep.subr.bf16.mxu0 %v2114_v17 }
  0x27   :  { %2117 = vmatpush3.bf16.msra.mxu0 %v2114_v17 }
  0x28   :  { %2119 = vmatprep.subr.bf16.mxu0 %v2118_v20 }
  0x2b   :  { %2121 = vmatpush3.bf16.msra.mxu0 %v2118_v20 }
  0xd9   :  { %v1976_v22 = vpop.f32.mrb[0].mxu0 }
  0xda   :  { %v173_v23 = vpop.f32.mrb[1].mxu0 }
  0xdb   :  { %v1977_v24 = vpop.f32.mrb[2].mxu0 }
  0xdc   :  { %v253_v25 = vpack.c.bf16 %v1977_v24, %v1976_v22  ;;  %v176_v26 = vpop.f32.mrb[3].mxu0  ;;  %v640_v22 = vld [vmem:[%s3043_s6 + $0x68] sm:$0xff]  ;;  %v641_v24 = vld [vmem:[%s3043_s6 + $0x70] sm:$0xff] }
  0xdd   :  { %v252_v27 = vpack.c.bf16 %v176_v26, %v173_v23  ;;  %v2122_v23 = vpack.c.bf16 %v640_v22, %v639_v21 }
  0xdf   :  { %1990 = vmatprep.subr.bf16.mxu1 %v252_v27  ;;  %2123 = vmatprep.subr.bf16.mxu0 %v2122_v23 }
  0xe0   :  { %1991 = vmatpush3.bf16.msra.mxu1 %v252_v27  ;;  %2125 = vmatpush3.bf16.msra.mxu0 %v2122_v23  ;;  %v2317_v27 = vmov 0  }
  0xe1   :  { %v1980_v28 = vpop.f32.mrb[4].mxu0  ;;  %1992 = vmatprep.subr.bf16.mxu1 %v253_v25  ;;  %2152 = vset.pattern.permute.xlu0 %v2317_v27 }
  0xe2   :  { %v189_v29 = vpop.f32.mrb[5].mxu0  ;;  %2153 = vset.pattern.permute.xlu1 %v2317_v27 }
  0xe3   :  { %v1981_v30 = vpop.f32.mrb[6].mxu0 }
  0xe4   :  { %v255_v31 = vpack.c.bf16 %v1981_v30, %v1980_v28  ;;  %v192_v32 = vpop.f32.mrb[7].mxu0  ;;  %1993 = vmatpush3.bf16.msra.mxu1 %v253_v25  ;;  %v642_v25 = vld [vmem:[%s3043_s6 + $0x78] sm:$0xff]  ;;  %v579_v28 = vld [vmem:[%s3042_s5] sm:$0xff]  ;;  %v581_v30 = vld [vmem:[%s3042_s5 + $0x10] sm:$0xff] }
  0xe5   :  { %v254_v33 = vpack.c.bf16 %v192_v32, %v189_v29  ;;  %v2126_v26 = vpack.c.bf16 %v642_v25, %v641_v24  ;;  %v580_v32 = vld [vmem:[%s3042_s5 + $0x8] sm:$0xff] }
  0xe7   :  { %1994 = vmatprep.subr.bf16.mxu1 %v254_v33  ;;  %2127 = vmatprep.subr.bf16.mxu0 %v2126_v26 }
  0xe8   :  { %1995 = vmatpush3.bf16.msra.mxu1 %v254_v33  ;;  %2129 = vmatpush3.bf16.msra.mxu0 %v2126_v26 }
  0xe9   :  { %v1984_v34 = vpop.f32.mrb[8].mxu0  ;;  %1996 = vmatprep.subr.bf16.mxu1 %v255_v31 }
  0xea   :  { %v205_v35 = vpop.f32.mrb[9].mxu0 }
  0xeb   :  { %v1985_v36 = vpop.f32.mrb[10].mxu0 }
  0xec   :  { %v257_v37 = vpack.c.bf16 %v1985_v36, %v1984_v34  ;;  %v208_v38 = vpop.f32.mrb[11].mxu0  ;;  %1997 = vmatpush3.bf16.msra.mxu1 %v255_v31  ;;  %v582_v36 = vld [vmem:[%s3042_s5 + $0x18] sm:$0xff] }
  0xed   :  { %v256_v39 = vpack.c.bf16 %v208_v38, %v205_v35 }
  0xef   :  { %1998 = vmatprep.subr.bf16.mxu1 %v256_v39 }
  0xf0   :  { %1999 = vmatpush3.bf16.msra.mxu1 %v256_v39 }
  0xf1   :  { %v1988_v40 = vpop.f32.mrb[12].mxu0  ;;  %2000 = vmatprep.subr.bf16.mxu1 %v257_v37 }
  0xf2   :  { %v221_v41 = vpop.f32.mrb[13].mxu0 }
  0xf3   :  { %v1989_v42 = vpop.f32.mrb[14].mxu0 }
  0xf4   :  { %v259_v43 = vpack.c.bf16 %v1989_v42, %v1988_v40  ;;  %v224_v44 = vpop.f32.mrb[15].mxu0  ;;  %2001 = vmatpush3.bf16.msra.mxu1 %v257_v37  ;;  %v583_v40 = vld [vmem:[%s3042_s5 + $0x20] sm:$0xff]  ;;  %v585_v42 = vld [vmem:[%s3042_s5 + $0x30] sm:$0xff] }
  0xf5   :  { %v258_v45 = vpack.c.bf16 %v224_v44, %v221_v41  ;;  %v584_v44 = vld [vmem:[%s3042_s5 + $0x28] sm:$0xff] }
  0xf7   :  { %2002 = vmatprep.subr.bf16.mxu1 %v258_v45 }
  0xf8   :  { %2003 = vmatpush3.bf16.msra.mxu1 %v258_v45 }
  0xf9   :  { %2004 = vmatprep.subr.bf16.mxu1 %v259_v43 }
  0xfc   :  { %2005 = vmatpush3.bf16.msra.mxu1 %v259_v43 }
  0xfd   :  { %2022 = vmatprep.subr.bf16.mxu1 %v2165_v46 }
  0xff   :  { %2007 = vmatmul.mubr.bf16.vlgmr.msra.gmra.mrb[0].mxu1 %v2164_v47 }
 0x100   :  { %2023 = vmatpush3.bf16.msra.mxu1 %v2165_v46  ;;  %2010 = vmatprep.mubr.bf16.mxu1 %v2166_v48  ;;  %v586_v48 = vld [vmem:[%s3042_s5 + $0x38] sm:$0xff] }
 0x101   :  { %2024 = vmatprep.subr.bf16.mxu1 %v2170_v49 }
 0x104   :  { %2025 = vmatpush3.bf16.msra.mxu1 %v2170_v49 }
 0x107   :  { %2011 = vmatmul.mubr.bf16.gmra.mrb[4].mxu1 %v2167_v50 }
 0x108   :  { %2014 = vmatprep.mubr.bf16.mxu1 %v2168_v51 }
 0x10f   :  { %2015 = vmatmul.mubr.bf16.gmra.mrb[8].mxu1 %v2169_v52 }
 0x110   :  { %2018 = vmatprep.mubr.bf16.mxu1 %v2171_v53  ;;  %v587_v53 = vld [vmem:[%s3042_s5 + $0x40] sm:$0xff] }
 0x117   :  { %2019 = vmatmul.mubr.bf16.gmra.mrb[12].mxu1 %v2172_v56  ;;  %v589_v56 = vld [vmem:[%s3042_s5 + $0x50] sm:$0xff] }
 0x118   :  { %2026 = vmatprep.mubr.msk.bf16.mxu1 %vm457_vm1, %v1887_v57 }
 0x11f   :  { %2027 = vmatmul.mubr.msk.bf16.vlgmr.msra.gmra.mrb[0].mxu1 %vm457_vm1, %v1888_v62 }
 0x120   :  { %2030 = vmatprep.mubr.msk.bf16.mxu1 %vm457_vm1, %v1889_v63  ;;  %v590_v63 = vld [vmem:[%s3042_s5 + $0x58] sm:$0xff] }
 0x127   :  { %2031 = vmatmul.mubr.msk.bf16.gmra.mrb[4].mxu1 %vm457_vm1, %v1890_v4 }
 0x128   :  { %2034 = vmatprep.mubr.msk.bf16.mxu1 %vm457_vm1, %v1891_v5  ;;  %v591_v5 = vld [vmem:[%s3042_s5 + $0x60] sm:$0xff] }
 0x12f   :  { %2035 = vmatmul.mubr.msk.bf16.gmra.mrb[8].mxu1 %vm457_vm1, %v1892_v10 }
 0x130   :  { %2038 = vmatprep.mubr.msk.bf16.mxu1 %vm457_vm1, %v1893_v11  ;;  %v592_v11 = vld [vmem:[%s3042_s5 + $0x68] sm:$0xff] }
 0x137   :  { %2039 = vmatmul.mubr.msk.bf16.gmra.mrb[12].mxu1 %vm457_vm1, %v1894_v14 }
 0x1f2   :  { %v2028_v29 = vpop.f32.mrb[0].mxu1 }
 0x1f3   :  { %v516_v31 = vpop.f32.mrb[1].mxu1  ;;  %v597_v35 = vadd.f32 %v2028_v29, %v581_v30 }
 0x1f4   :  { %v595_v33 = vadd.f32 %v579_v28, %v516_v31  ;;  %v2029_v34 = vpop.f32.mrb[2].mxu1 }
 0x1f5   :  { %v519_v37 = vpop.f32.mrb[3].mxu1  ;;  %v598_v39 = vadd.f32 %v2029_v34, %v582_v36 }
 0x1f6   :  { %2181 = vtanh.f32 %v595_v33  ;;  %v596_v38 = vadd.f32 %v580_v32, %v519_v37 }
 0x1f8   :  { %2183 = vtanh.f32 %v596_v38 }
 0x1f9   :  { %2185 = vtanh.f32 %v597_v35 }
 0x1fa   :  { %v2032_v41 = vpop.f32.mrb[4].mxu1  ;;  %2187 = vtanh.f32 %v598_v39 }
 0x1fb   :  { %v532_v43 = vpop.f32.mrb[5].mxu1  ;;  %v601_v47 = vadd.f32 %v2032_v41, %v585_v42 }
 0x1fc   :  { %v599_v45 = vadd.f32 %v583_v40, %v532_v43  ;;  %v2033_v46 = vpop.f32.mrb[6].mxu1 }
 0x1fd   :  { %v535_v49 = vpop.f32.mrb[7].mxu1  ;;  %v602_v52 = vadd.f32 %v2033_v46, %v586_v48  ;;  %v852_v46 = vlaneseq }
 0x1fe   :  { %2189 = vtanh.f32 %v599_v45  ;;  %v600_v50 = vadd.f32 %v584_v44, %v535_v49 }
 0x1ff   :  { %v853_v48 = vand.u32 127, %v852_v46  ;;  %v2633_v49 = vshrl.u32 %v852_v46, 7 }
 0x200   :  { %v2182_v51 = vpop.eup %2181  ;;  %2191 = vtanh.f32 %v600_v50 }
 0x201   :  { %2193 = vtanh.f32 %v601_v47  ;;  %2074 = vmatprep.mubr.f32.mxu0 %v2182_v51  ;;  %v2636_v51 = vsub.s32 %v853_v48, %v2633_v49  ;;  %v2671_v48 = vsub.s32 0, %v2633_v49 }
 0x202   :  { %v2184_v54 = vpop.eup %2183  ;;  %v2036_v55 = vpop.f32.mrb[8].mxu1  ;;  %2195 = vtanh.f32 %v602_v52 }
 0x203   :  { %v2186_v57 = vpop.eup %2185  ;;  %v548_v58 = vpop.f32.mrb[9].mxu1  ;;  %2075 = vmatmul.mubr.f32.vlgmr.msra.gmra.mrb[16].mxu0 %v2184_v54  ;;  %v605_v62 = vadd.f32 %v2036_v55, %v589_v56 }
 0x204   :  { %v603_v60 = vadd.f32 %v587_v53, %v548_v58  ;;  %v2037_v61 = vpop.f32.mrb[10].mxu1  ;;  %2077 = vmatprep.mubr.f32.mxu0 %v2186_v57  ;;  %v2188_v1 = vpop.eup %2187 }
 0x205   :  { %v551_v0 = vpop.f32.mrb[11].mxu1  ;;  %v606_v4 = vadd.f32 %v2037_v61, %v590_v63 }
 0x206   :  { %2197 = vtanh.f32 %v603_v60  ;;  %v604_v2 = vadd.f32 %v588_v59, %v551_v0 }
 0x207   :  { %2078 = vmatmul.mubr.f32.gmra.mrb[18].mxu0 %v2188_v1 }
 0x208   :  { %v2190_v3 = vpop.eup %2189  ;;  %2199 = vtanh.f32 %v604_v2 }
 0x209   :  { %2201 = vtanh.f32 %v605_v62  ;;  %2080 = vmatprep.mubr.f32.mxu0 %v2190_v3 }
 0x20a   :  { %v2192_v6 = vpop.eup %2191  ;;  %v2040_v7 = vpop.f32.mrb[12].mxu1  ;;  %2203 = vtanh.f32 %v606_v4 }
 0x20b   :  { %v2194_v9 = vpop.eup %2193  ;;  %v564_v10 = vpop.f32.mrb[13].mxu1  ;;  %2081 = vmatmul.mubr.f32.gmra.mrb[20].mxu0 %v2192_v6  ;;  %v609_v14 = vadd.f32 %v2040_v7, %v593_v8 }
 0x20c   :  { %v607_v12 = vadd.f32 %v591_v5, %v564_v10  ;;  %v2041_v13 = vpop.f32.mrb[14].mxu1  ;;  %2083 = vmatprep.mubr.f32.mxu0 %v2194_v9  ;;  %v2196_v17 = vpop.eup %2195 }
 0x20d   :  { %v567_v16 = vpop.f32.mrb[15].mxu1  ;;  %v610_v20 = vadd.f32 %v2041_v13, %v594_v15 }
 0x20e   :  { %2205 = vtanh.f32 %v607_v12  ;;  %v608_v18 = vadd.f32 %v592_v11, %v567_v16 }
 0x20f   :  { %2084 = vmatmul.mubr.f32.gmra.mrb[22].mxu0 %v2196_v17 }
 0x210   :  { %v2198_v19 = vpop.eup %2197  ;;  %2207 = vtanh.f32 %v608_v18 }
 0x211   :  { %2209 = vtanh.f32 %v609_v14  ;;  %2086 = vmatprep.mubr.f32.mxu0 %v2198_v19 }
 0x212   :  { %v2200_v21 = vpop.eup %2199  ;;  %2211 = vtanh.f32 %v610_v20 }
 0x213   :  { %v2202_v22 = vpop.eup %2201  ;;  %2087 = vmatmul.mubr.f32.gmra.mrb[24].mxu0 %v2200_v21 }
 0x214   :  { %2089 = vmatprep.mubr.f32.mxu0 %v2202_v22  ;;  %v2204_v23 = vpop.eup %2203 }
 0x217   :  { %2090 = vmatmul.mubr.f32.gmra.mrb[26].mxu0 %v2204_v23 }
 0x218   :  { %v2206_v24 = vpop.eup %2205 }
 0x219   :  { %2092 = vmatprep.mubr.f32.mxu0 %v2206_v24 }
 0x21a   :  { %v2208_v25 = vpop.eup %2207 }
 0x21b   :  { %v2210_v26 = vpop.eup %2209  ;;  %2093 = vmatmul.mubr.f32.gmra.mrb[28].mxu0 %v2208_v25 }
 0x21c   :  { %2095 = vmatprep.mubr.f32.mxu0 %v2210_v26  ;;  %v2212_v27 = vpop.eup %2211 }
 0x21f   :  { %2096 = vmatmul.mubr.f32.gmra.mrb[30].mxu0 %v2212_v27 }
 0x2d6   :  { %v2585_v28 = vpop.f32.mrb[16].mxu0 }
 0x2d7   :  { %808 = vperm.xlu0 %2152, %v2585_v28   ;;  %v2588_v29 = vpop.f32.mrb[17].mxu0 }
 0x2da   :  { %v2590_v30 = vpop.f32.mrb[18].mxu0 }
 0x2db   :  { %805 = vperm.xlu0 %2152, %v2588_v29   ;;  %v2593_v31 = vpop.f32.mrb[19].mxu0 }
 0x2de   :  { %v2595_v32 = vpop.f32.mrb[20].mxu0 }
 0x2df   :  { %814 = vperm.xlu0 %2152, %v2590_v30   ;;  %v2598_v33 = vpop.f32.mrb[21].mxu0 }
 0x2e2   :  { %v2600_v34 = vpop.f32.mrb[22].mxu0 }
 0x2e3   :  { %811 = vperm.xlu0 %2152, %v2593_v31   ;;  %v2603_v35 = vpop.f32.mrb[23].mxu0 }
 0x2e6   :  { %v2605_v36 = vpop.f32.mrb[24].mxu0 }
 0x2e7   :  { %820 = vperm.xlu0 %2152, %v2595_v32   ;;  %832 = vperm.xlu1 %2153, %v2605_v36   ;;  %v2609_v37 = vpop.f32.mrb[25].mxu0 }
 0x2ea   :  { %v2611_v38 = vpop.f32.mrb[26].mxu0 }
 0x2eb   :  { %817 = vperm.xlu0 %2152, %v2598_v33   ;;  %829 = vperm.xlu1 %2153, %v2609_v37   ;;  %v2615_v39 = vpop.f32.mrb[27].mxu0 }
 0x2ee   :  { %v2617_v40 = vpop.f32.mrb[28].mxu0 }
 0x2ef   :  { %823 = vperm.xlu0 %2152, %v2603_v35   ;;  %838 = vperm.xlu1 %2153, %v2611_v38   ;;  %v2621_v41 = vpop.f32.mrb[29].mxu0 }
 0x2f2   :  { %v2623_v42 = vpop.f32.mrb[30].mxu0 }
 0x2f3   :  { %826 = vperm.xlu0 %2152, %v2600_v34   ;;  %835 = vperm.xlu1 %2153, %v2615_v39   ;;  %v2627_v43 = vpop.f32.mrb[31].mxu0 }
 0x2f7   :  { %844 = vperm.xlu1 %2153, %v2617_v40  }
 0x2fb   :  { %841 = vperm.xlu1 %2153, %v2621_v41  }
 0x2ff   :  { %847 = vperm.xlu1 %2153, %v2627_v43  }
 0x303   :  { %850 = vperm.xlu1 %2153, %v2623_v42  }
 0x356   :  { %v809_v44 = vpop.permute.xlu0 %808 }
 0x357   :  { %v861_v56 = vrot.slane %v809_v44, %v2636_v51 }
 0x35a   :  { %v806_v45 = vpop.permute.xlu0 %805 }
 0x35b   :  { %v857_v54 = vrot.slane %v806_v45, %v2636_v51 }
 0x35d   :  { %v919_v59 = vsel %vm918_vm2, %v861_v56, %v857_v54 }
 0x35e   :  { %v815_v47 = vpop.permute.xlu0 %814 }
 0x35f   :  { %v869_v62 = vrot.slane %v815_v47, %v2636_v51 }
 0x362   :  { %v812_v50 = vpop.permute.xlu0 %811 }
 0x363   :  { %v865_v55 = vrot.slane %v812_v50, %v2636_v51  ;;  %v2674_v50 = vsub.s32 1, %v2633_v49 }
 0x365   :  { %v921_v60 = vsel %vm920_vm3, %v865_v55, %v919_v59 }
 0x366   :  { %v821_v52 = vpop.permute.xlu0 %820  ;;  %v833_v53 = vpop.permute.xlu1 %832  ;;  %v923_v1 = vsel %vm922_vm4, %v869_v62, %v921_v60 }
 0x367   :  { %v877_v4 = vrot.slane %v821_v52, %v2636_v51  ;;  %v893_v15 = vrot.slane %v833_v53, %v2636_v51  ;;  %v2677_v52 = vsub.s32 2, %v2633_v49  ;;  %v2680_v53 = vsub.s32 3, %v2633_v49 }
 0x36a   :  { %v818_v57 = vpop.permute.xlu0 %817  ;;  %v830_v58 = vpop.permute.xlu1 %829 }
 0x36b   :  { %v873_v61 = vrot.slane %v818_v57, %v2636_v51  ;;  %v889_v13 = vrot.slane %v830_v58, %v2636_v51  ;;  %v2686_v58 = vsub.s32 4, %v2633_v49 }
 0x36d   :  { %v925_v2 = vsel %vm924_vm5, %v873_v61, %v923_v1  ;;  %v932_v17 = vsel %vm918_vm2, %v893_v15, %v889_v13  ;;  %v2693_v1 = vsub.s32 5, %v2633_v49 }
 0x36e   :  { %v824_v63 = vpop.permute.xlu0 %823  ;;  %v839_v0 = vpop.permute.xlu1 %838  ;;  %v927_v8 = vsel %vm926_vm6, %v877_v4, %v925_v2 }
 0x36f   :  { %v881_v3 = vrot.slane %v824_v63, %v2636_v51  ;;  %v901_v20 = vrot.slane %v839_v0, %v2636_v51 }
 0x371   :  { %v929_v9 = vsel %vm928_vm7, %v881_v3, %v927_v8 }
 0x372   :  { %v827_v5 = vpop.permute.xlu0 %826  ;;  %v836_v6 = vpop.permute.xlu1 %835 }
 0x373   :  { %v885_v7 = vrot.slane %v827_v5, %v2636_v51  ;;  %v897_v14 = vrot.slane %v836_v6, %v2636_v51 }
 0x375   :  { %v931_v10 = vsel %vm930_vm8, %v885_v7, %v929_v9  ;;  %v933_v18 = vsel %vm920_vm3, %v897_v14, %v932_v17 }
 0x376   :  { %v845_v11 = vpop.permute.xlu1 %844  ;;  %v942_v12 = vsel %vm941_vm9, %v931_v10, -inf  ;;  %v934_v22 = vsel %vm922_vm4, %v901_v20, %v933_v18 }
 0x377   :  { %943 = vmax.xlane.f32.xlu0 %v942_v12  ;;  %v909_v25 = vrot.slane %v845_v11, %v2636_v51 }
 0x37a   :  { %v842_v16 = vpop.permute.xlu1 %841 }
 0x37b   :  { %v905_v19 = vrot.slane %v842_v16, %v2636_v51 }
 0x37d   :  { %v935_v23 = vsel %vm924_vm5, %v905_v19, %v934_v22 }
 0x37e   :  { %v848_v21 = vpop.permute.xlu1 %847  ;;  %v936_v44 = vsel %vm926_vm6, %v909_v25, %v935_v23 }
 0x37f   :  { %v913_v24 = vrot.slane %v848_v21, %v2636_v51 }
 0x381   :  { %v937_v45 = vsel %vm928_vm7, %v913_v24, %v936_v44 }
 0x382   :  { %v851_v26 = vpop.permute.xlu1 %850 }
 0x383   :  { %v917_v27 = vrot.slane %v851_v26, %v2636_v51 }
 0x385   :  { %v938_v46 = vsel %vm930_vm8, %v917_v27, %v937_v45 }
 0x386   :  { %v945_v47 = vsel %vm941_vm9, %v938_v46, -inf }
 0x387   :  { %946 = vmax.xlane.f32.xlu1 %v945_v47 }
 0x404   :  { %v944_v54 = vpop.xlane.xlu0 %943 }
 0x405   :  { %v953_v55 = vrot.slane %v944_v54, %v2671_v48  ;;  %v957_v56 = vrot.slane %v944_v54, %v2674_v50  ;;  %v961_v57 = vrot.slane %v944_v54, %v2677_v52  ;;  %v965_v59 = vrot.slane %v944_v54, %v2680_v53 }
 0x406   :  { %v969_v2 = vrot.slane %v944_v54, %v2686_v58  ;;  %v973_v5 = vrot.slane %v944_v54, %v2693_v1 }
 0x407   :  { %v1030_v60 = vsub.f32 %v2588_v29, %v953_v55  ;;  %v1031_v61 = vsub.f32 %v2585_v28, %v957_v56  ;;  %v1032_v62 = vsub.f32 %v2593_v31, %v961_v57  ;;  %v1033_v3 = vsub.f32 %v2590_v30, %v965_v59 }
 0x408   :  { %v1034_v29 = vsub.f32 %v2598_v33, %v969_v2  ;;  %v2700_v31 = vsub.s32 6, %v2633_v49  ;;  %v1035_v6 = vsub.f32 %v2595_v32, %v973_v5  ;;  %v2711_v33 = vsub.s32 7, %v2633_v49 }
 0x409   :  { %v1046_v63 = vmul.f32 1.442695, %v1030_v60  ;;  %v1048_v0 = vmul.f32 1.442695, %v1031_v61  ;;  %v1050_v4 = vmul.f32 1.442695, %v1032_v62 }
 0x40a   :  { %v1052_v28 = vmul.f32 1.442695, %v1033_v3  ;;  %v1054_v7 = vmul.f32 1.442695, %v1034_v29  ;;  %v977_v13 = vrot.slane %v944_v54, %v2700_v31  ;;  %v1056_v32 = vmul.f32 1.442695, %v1035_v6 }
 0x40b   :  { %2213 = vpow2.f32 %v1046_v63  ;;  %v981_v20 = vrot.slane %v944_v54, %v2711_v33 }
 0x40c   :  { %2215 = vpow2.f32 %v1048_v0  ;;  %v1036_v21 = vsub.f32 %v2603_v35, %v977_v13 }
 0x40d   :  { %2217 = vpow2.f32 %v1050_v4 }
 0x40e   :  { %2219 = vpow2.f32 %v1052_v28  ;;  %v1058_v25 = vmul.f32 1.442695, %v1036_v21 }
 0x40f   :  { %2221 = vpow2.f32 %v1054_v7 }
 0x410   :  { %2223 = vpow2.f32 %v1056_v32 }
 0x414   :  { %v947_v8 = vpop.xlane.xlu1 %946 }
 0x415   :  { %v2703_v9 = vpop.eup %2213  ;;  %v985_v30 = vrot.slane %v947_v8, %v2671_v48  ;;  %v989_v10 = vrot.slane %v947_v8, %v2674_v50  ;;  %v993_v11 = vrot.slane %v947_v8, %v2677_v52  ;;  %v997_v16 = vrot.slane %v947_v8, %v2680_v53 }
 0x416   :  { %v2708_v12 = vpop.eup %2215  ;;  %1095 = vperm.xlu0 %2152, %v2703_v9   ;;  %v1005_v26 = vrot.slane %v947_v8, %v2693_v1  ;;  %v1009_v45 = vrot.slane %v947_v8, %v2700_v31 }
 0x417   :  { %v1038_v14 = vsub.f32 %v2609_v37, %v985_v30  ;;  %v1039_v15 = vsub.f32 %v2605_v36, %v989_v10  ;;  %1098 = vperm.xlu1 %2153, %v2708_v12   ;;  %v1040_v17 = vsub.f32 %v2615_v39, %v993_v11  ;;  %v2720_v18 = vpop.eup %2217  ;;  %v1001_v37 = vrot.slane %v947_v8, %v2686_v58 }
 0x418   :  { %v1041_v36 = vsub.f32 %v2611_v38, %v997_v16  ;;  %v2727_v24 = vpop.eup %2219  ;;  %v1037_v39 = vsub.f32 %v2600_v34, %v981_v20  ;;  %v1043_v46 = vsub.f32 %v2617_v40, %v1005_v26  ;;  %v1044_v55 = vsub.f32 %v2627_v43, %v1009_v45 }
 0x419   :  { %v1064_v19 = vmul.f32 1.442695, %v1039_v15  ;;  %v1062_v22 = vmul.f32 1.442695, %v1038_v14  ;;  %v1066_v23 = vmul.f32 1.442695, %v1040_v17  ;;  %v1042_v35 = vsub.f32 %v2621_v41, %v1001_v37  ;;  %v2733_v44 = vpop.eup %2221 }
 0x41a   :  { %1101 = vperm.xlu0 %2152, %v2720_v18   ;;  %v1068_v27 = vmul.f32 1.442695, %v1041_v36  ;;  %v1060_v38 = vmul.f32 1.442695, %v1037_v39  ;;  %v2738_v47 = vpop.eup %2223  ;;  %v1013_v41 = vrot.slane %v947_v8, %v2711_v33  ;;  %v1072_v56 = vmul.f32 1.442695, %v1043_v46 }
 0x41b   :  { %2225 = vpow2.f32 %v1064_v19  ;;  %v1070_v34 = vmul.f32 1.442695, %v1042_v35  ;;  %v1074_v60 = vmul.f32 1.442695, %v1044_v55 }
 0x41c   :  { %2227 = vpow2.f32 %v1062_v22  ;;  %v1045_v59 = vsub.f32 %v2623_v42, %v1013_v41 }
 0x41d   :  { %2229 = vpow2.f32 %v1066_v23 }
 0x41e   :  { %1104 = vperm.xlu0 %2152, %v2727_v24   ;;  %2231 = vpow2.f32 %v1058_v25  ;;  %v1076_v43 = vmul.f32 1.442695, %v1045_v59 }
 0x41f   :  { %2233 = vpow2.f32 %v1068_v27 }
 0x420   :  { %2235 = vpow2.f32 %v1060_v38 }
 0x421   :  { %2237 = vpow2.f32 %v1070_v34 }
 0x422   :  { %1107 = vperm.xlu0 %2152, %v2733_v44   ;;  %2239 = vpow2.f32 %v1072_v56 }
 0x423   :  { %2241 = vpow2.f32 %v1074_v60 }
 0x424   :  { %2243 = vpow2.f32 %v1076_v43 }
 0x425   :  { %v2740_v54 = vpop.eup %2225 }
 0x426   :  { %1110 = vperm.xlu0 %2152, %v2738_v47   ;;  %1122 = vperm.xlu1 %2153, %v2740_v54   ;;  %v2746_v57 = vpop.eup %2227 }
 0x427   :  { %v2748_v40 = vpop.eup %2229 }
 0x428   :  { %v2753_v61 = vpop.eup %2231 }
 0x429   :  { %v2755_v62 = vpop.eup %2233 }
 0x42a   :  { %1119 = vperm.xlu0 %2152, %v2746_v57   ;;  %1125 = vperm.xlu1 %2153, %v2748_v40   ;;  %v2759_v63 = vpop.eup %2235 }
 0x42b   :  { %v2761_v0 = vpop.eup %2237 }
 0x42c   :  { %v2765_v42 = vpop.eup %2239 }
 0x42d   :  { %v2768_v2 = vpop.eup %2241 }
 0x42e   :  { %1113 = vperm.xlu0 %2152, %v2753_v61   ;;  %1128 = vperm.xlu1 %2153, %v2755_v62   ;;  %v2771_v3 = vpop.eup %2243 }
 0x432   :  { %1116 = vperm.xlu0 %2152, %v2759_v63   ;;  %1131 = vperm.xlu1 %2153, %v2761_v0  }
 0x436   :  { %1134 = vperm.xlu1 %2153, %v2765_v42  }
 0x43a   :  { %1137 = vperm.xlu1 %2153, %v2768_v2  }
 0x43e   :  { %1140 = vperm.xlu1 %2153, %v2771_v3  }
 0x495   :  { %v1096_v4 = vpop.permute.xlu0 %1095 }
 0x496   :  { %v1099_v6 = vpop.permute.xlu1 %1098  ;;  %v1145_v10 = vrot.slane %v1096_v4, %v2636_v51 }
 0x497   :  { %v1149_v11 = vrot.slane %v1099_v6, %v2636_v51 }
 0x499   :  { %v1102_v5 = vpop.permute.xlu0 %1101  ;;  %v1206_v17 = vsel %vm918_vm2, %v1149_v11, %v1145_v10 }
 0x49a   :  { %v1153_v32 = vrot.slane %v1102_v5, %v2636_v51 }
 0x49c   :  { %v1207_v21 = vsel %vm920_vm3, %v1153_v32, %v1206_v17 }
 0x49d   :  { %v1105_v29 = vpop.permute.xlu0 %1104 }
 0x49e   :  { %v1157_v14 = vrot.slane %v1105_v29, %v2636_v51 }
 0x4a0   :  { %v1208_v37 = vsel %vm922_vm4, %v1157_v14, %v1207_v21 }
 0x4a1   :  { %v1108_v28 = vpop.permute.xlu0 %1107 }
 0x4a2   :  { %v1161_v15 = vrot.slane %v1108_v28, %v2636_v51 }
 0x4a4   :  { %v1209_v36 = vsel %vm924_vm5, %v1161_v15, %v1208_v37 }
 0x4a5   :  { %v1111_v7 = vpop.permute.xlu0 %1110  ;;  %v1123_v8 = vpop.permute.xlu1 %1122 }
 0x4a6   :  { %v1165_v19 = vrot.slane %v1111_v7, %v2636_v51  ;;  %v1181_v34 = vrot.slane %v1123_v8, %v2636_v51 }
 0x4a8   :  { %v1210_v39 = vsel %vm926_vm6, %v1165_v19, %v1209_v36 }
 0x4a9   :  { %v1120_v30 = vpop.permute.xlu0 %1119  ;;  %v1126_v13 = vpop.permute.xlu1 %1125 }
 0x4aa   :  { %v1177_v38 = vrot.slane %v1120_v30, %v2636_v51  ;;  %v1185_v41 = vrot.slane %v1126_v13, %v2636_v51 }
 0x4ac   :  { %v1213_v55 = vsel %vm918_vm2, %v1181_v34, %v1177_v38 }
 0x4ad   :  { %v1114_v16 = vpop.permute.xlu0 %1113  ;;  %v1129_v20 = vpop.permute.xlu1 %1128  ;;  %v1214_v4 = vsel %vm920_vm3, %v1185_v41, %v1213_v55 }
 0x4ae   :  { %v1169_v22 = vrot.slane %v1114_v16, %v2636_v51  ;;  %v1189_v56 = vrot.slane %v1129_v20, %v2636_v51 }
 0x4b0   :  { %v1211_v35 = vsel %vm928_vm7, %v1169_v22, %v1210_v39  ;;  %v1215_v29 = vsel %vm922_vm4, %v1189_v56, %v1214_v4 }
 0x4b1   :  { %v1117_v23 = vpop.permute.xlu0 %1116  ;;  %v1132_v26 = vpop.permute.xlu1 %1131 }
 0x4b2   :  { %v1173_v25 = vrot.slane %v1117_v23, %v2636_v51  ;;  %v1193_v59 = vrot.slane %v1132_v26, %v2636_v51 }
 0x4b4   :  { %v1212_v27 = vsel %vm930_vm8, %v1173_v25, %v1211_v35  ;;  %v1216_v28 = vsel %vm924_vm5, %v1193_v59, %v1215_v29 }
 0x4b5   :  { %v1222_v45 = vsel %vm941_vm9, %v1212_v27, 0.0  ;;  %v1135_v46 = vpop.permute.xlu1 %1134 }
 0x4b6   :  { %1223 = vadd.xlane.f32.xlu0 %v1222_v45  ;;  %v1197_v43 = vrot.slane %v1135_v46, %v2636_v51 }
 0x4b8   :  { %v1217_v7 = vsel %vm926_vm6, %v1197_v43, %v1216_v28 }
 0x4b9   :  { %v1138_v60 = vpop.permute.xlu1 %1137 }
 0x4ba   :  { %v1201_v5 = vrot.slane %v1138_v60, %v2636_v51 }
 0x4bc   :  { %v1218_v30 = vsel %vm928_vm7, %v1201_v5, %v1217_v7 }
 0x4bd   :  { %v1141_v6 = vpop.permute.xlu1 %1140 }
 0x4be   :  { %v1205_v8 = vrot.slane %v1141_v6, %v2636_v51 }
 0x4c0   :  { %v1219_v10 = vsel %vm930_vm8, %v1205_v8, %v1218_v30 }
 0x4c1   :  { %v1225_v11 = vsel %vm941_vm9, %v1219_v10, 0.0 }
 0x4c2   :  { %1226 = vadd.xlane.f32.xlu1 %v1225_v11 }
 0x543   :  { %v1224_v13 = vpop.xlane.xlu0 %1223 }
 0x544   :  { %v1233_v32 = vrot.slane %v1224_v13, %v2671_v48  ;;  %v1237_v14 = vrot.slane %v1224_v13, %v2674_v50  ;;  %v1241_v15 = vrot.slane %v1224_v13, %v2677_v52  ;;  %v1245_v16 = vrot.slane %v1224_v13, %v2680_v53 }
 0x545   :  { %v1249_v17 = vrot.slane %v1224_v13, %v2686_v58  ;;  %v1253_v19 = vrot.slane %v1224_v13, %v2693_v1  ;;  %v1257_v20 = vrot.slane %v1224_v13, %v2700_v31  ;;  %v1261_v21 = vrot.slane %v1224_v13, %v2711_v33 }
 0x546   :  { %2245 = vrcp.f32 %v1233_v32 }
 0x547   :  { %2247 = vrcp.f32 %v1237_v14 }
 0x548   :  { %2249 = vrcp.f32 %v1241_v15 }
 0x549   :  { %2251 = vrcp.f32 %v1245_v16 }
 0x54a   :  { %2253 = vrcp.f32 %v1249_v17 }
 0x54b   :  { %2255 = vrcp.f32 %v1253_v19 }
 0x54c   :  { %2257 = vrcp.f32 %v1257_v20 }
 0x54d   :  { %2259 = vrcp.f32 %v1261_v21 }
 0x54f   :  { %v1227_v37 = vpop.xlane.xlu1 %1226 }
 0x550   :  { %v2246_v22 = vpop.eup %2245  ;;  %v1265_v39 = vrot.slane %v1227_v37, %v2671_v48  ;;  %v1269_v25 = vrot.slane %v1227_v37, %v2674_v50  ;;  %v1273_v26 = vrot.slane %v1227_v37, %v2677_v52  ;;  %v1277_v38 = vrot.slane %v1227_v37, %v2680_v53 }
 0x551   :  { %v2248_v36 = vpop.eup %2247  ;;  %v1311_v23 = vmul.f32 %v2246_v22, %v2703_v9  ;;  %v1281_v46 = vrot.slane %v1227_v37, %v2686_v58  ;;  %v1285_v48 = vrot.slane %v1227_v37, %v2693_v1  ;;  %v1289_v53 = vrot.slane %v1227_v37, %v2700_v31 }
 0x552   :  { %v2250_v35 = vpop.eup %2249  ;;  %v1313_v27 = vmul.f32 %v2248_v36, %v2708_v12  ;;  %2261 = vrcp.f32 %v1265_v39  ;;  %v1293_v58 = vrot.slane %v1227_v37, %v2711_v33  ;;  %v2277_v37 = vld [vmem:[%s3037_s0] sm:$0xf] }
 0x553   :  { %v2252_v45 = vpop.eup %2251  ;;  %1359 = vperm.xlu0 %2152, %v1311_v23   ;;  %2263 = vrcp.f32 %v1269_v25  ;;  %v1315_v9 = vmul.f32 %v2250_v35, %v2720_v18 }
 0x554   :  { %1362 = vperm.xlu1 %2153, %v1313_v27   ;;  %2265 = vrcp.f32 %v1273_v26  ;;  %v2254_v50 = vpop.eup %2253  ;;  %v1488_v34 = vpack.c.bf16 %v1313_v27, %v1311_v23  ;;  %v1317_v52 = vmul.f32 %v2252_v45, %v2727_v24  ;;  %v2278_v23 = vld [vmem:[%s3037_s0 + $0x4] sm:$0xf] }
 0x555   :  { %2267 = vrcp.f32 %v1277_v38  ;;  %v2256_v12 = vpop.eup %2255  ;;  %v1319_v56 = vmul.f32 %v2254_v50, %v2733_v44  ;;  %v2279_v50 = vld [vmem:[%s3037_s0 + $0x8] sm:$0xf] }
 0x556   :  { %2269 = vrcp.f32 %v1281_v46  ;;  %v2258_v41 = vpop.eup %2257  ;;  %v1489_v18 = vpack.c.bf16 %v1317_v52, %v1315_v9  ;;  %v1321_v1 = vmul.f32 %v2256_v12, %v2738_v47 }
 0x557   :  { %1365 = vperm.xlu0 %2152, %v1315_v9   ;;  %2271 = vrcp.f32 %v1285_v48  ;;  %v2260_v55 = vpop.eup %2259  ;;  %v1323_v31 = vmul.f32 %v2258_v41, %v2753_v61 }
 0x558   :  { %1498 = vperm.xlu1 %2153, %v1488_v34   ;;  %2273 = vrcp.f32 %v1289_v53  ;;  %v1490_v60 = vpack.c.bf16 %v1321_v1, %v1319_v56  ;;  %v1325_v4 = vmul.f32 %v2260_v55, %v2759_v63 }
 0x559   :  { %2275 = vrcp.f32 %v1293_v58 }
 0x55a   :  { %v1491_v47 = vpack.c.bf16 %v1325_v4, %v1323_v31 }
 0x55c   :  { %1502 = vperm.xlu1 %2153, %v1489_v18   ;;  %v2262_v24 = vpop.eup %2261 }
 0x55d   :  { %v2264_v59 = vpop.eup %2263  ;;  %v1327_v43 = vmul.f32 %v2262_v24, %v2746_v57 }
 0x55e   :  { %v2266_v5 = vpop.eup %2265  ;;  %v1329_v33 = vmul.f32 %v2264_v59, %v2740_v54 }
 0x55f   :  { %v2268_v29 = vpop.eup %2267  ;;  %1383 = vperm.xlu0 %2152, %v1327_v43   ;;  %v1331_v6 = vmul.f32 %v2266_v5, %v2748_v40 }
 0x560   :  { %1506 = vperm.xlu1 %2153, %v1490_v60   ;;  %v2270_v44 = vpop.eup %2269  ;;  %v1492_v28 = vpack.c.bf16 %v1329_v33, %v1327_v43  ;;  %v1333_v7 = vmul.f32 %v2268_v29, %v2755_v62  ;;  %v2318_v62 = vmov 839922192   ;;  %v2281_v29 = vld [vmem:[%s3037_s0 + $0x10] sm:$0xf] }
 0x561   :  { %v2272_v8 = vpop.eup %2271  ;;  %v1335_v63 = vmul.f32 %v2270_v44, %v2761_v0  ;;  %v1537_v0 = vunpack.c.l.s4 %v2318_v62 }
 0x562   :  { %v2274_v57 = vpop.eup %2273  ;;  %v1493_v61 = vpack.c.bf16 %v1333_v7, %v1331_v6  ;;  %v1337_v30 = vmul.f32 %v2272_v8, %v2765_v42  ;;  %v2319_v42 = vmov 1985246804  }
 0x563   :  { %1514 = vperm.xlu0 %2152, %v1492_v28   ;;  %v2276_v54 = vpop.eup %2275  ;;  %v1339_v11 = vmul.f32 %v2274_v57, %v2768_v2  ;;  %v1544_v2 = vunpack.c.l.s4 %v2319_v42  ;;  %v1538_v32 = vunpack.c.0.s8 %v1537_v0 }
 0x564   :  { %1510 = vperm.xlu1 %2153, %v1491_v47   ;;  %v1494_v10 = vpack.c.bf16 %v1337_v30, %v1335_v63  ;;  %v1341_v13 = vmul.f32 %v2276_v54, %v2771_v3 }
 0x565   :  { %v1545_v3 = vunpack.c.0.s8 %v1544_v2  ;;  %v2839_v16 = vsub.s32 %v1538_v32, %v2633_v49  ;;  %v2283_v2 = vld [vmem:[%s3037_s0 + $0x20] sm:$0xf] }
 0x566   :  { %v1495_v40 = vpack.c.bf16 %v1341_v13, %v1339_v11 }
 0x567   :  { %1518 = vperm.xlu0 %2152, %v1493_v61   ;;  %v2842_v17 = vsub.s32 %v1545_v3, %v2633_v49  ;;  %v2282_v61 = vld [vmem:[%s3037_s0 + $0x14] sm:$0xf]  ;;  %v2284_v3 = vld [vmem:[%s3037_s0 + $0x24] sm:$0xf] }
 0x568   :  { %1386 = vperm.xlu1 %2153, %v1329_v33  }
 0x56b   :  { %1522 = vperm.xlu0 %2152, %v1494_v10  }
 0x56c   :  { %1389 = vperm.xlu1 %2153, %v1331_v6  }
 0x56f   :  { %1526 = vperm.xlu0 %2152, %v1495_v40  }
 0x570   :  { %1392 = vperm.xlu1 %2153, %v1333_v7  }
 0x573   :  { %1368 = vperm.xlu0 %2152, %v1317_v52   ;;  %v2280_v52 = vld [vmem:[%s3037_s0 + $0xc] sm:$0xf] }
 0x574   :  { %1395 = vperm.xlu1 %2153, %v1335_v63  }
 0x577   :  { %1371 = vperm.xlu0 %2152, %v1319_v56  }
 0x578   :  { %1398 = vperm.xlu1 %2153, %v1337_v30  }
 0x57b   :  { %1374 = vperm.xlu0 %2152, %v1321_v1  }
 0x57c   :  { %1401 = vperm.xlu1 %2153, %v1339_v11  }
 0x57f   :  { %1377 = vperm.xlu0 %2152, %v1323_v31  }
 0x580   :  { %1404 = vperm.xlu1 %2153, %v1341_v13  }
 0x583   :  { %1380 = vperm.xlu0 %2152, %v1325_v4  }
 0x5d2   :  { %v1360_v15 = vpop.permute.xlu0 %1359 }
 0x5d3   :  { %v1363_v14 = vpop.permute.xlu1 %1362  ;;  %v1409_v25 = vrot.slane %v1360_v15, %v2636_v51 }
 0x5d4   :  { %v1413_v49 = vrot.slane %v1363_v14, %v2636_v51 }
 0x5d6   :  { %v1366_v22 = vpop.permute.xlu0 %1365  ;;  %v1470_v18 = vsel %vm918_vm2, %v1413_v49, %v1409_v25 }
 0x5d7   :  { %v1499_v19 = vpop.permute.xlu1 %1498  ;;  %v1417_v46 = vrot.slane %v1366_v22, %v2636_v51 }
 0x5d8   :  { %v1542_v20 = vrot.slane %v1499_v19, %v2839_v16  ;;  %v1549_v21 = vrot.slane %v1499_v19, %v2842_v17 }
 0x5d9   :  { %v2870_v59 = vsel %vm920_vm3, %v1417_v46, %v1470_v18 }
 0x5da   :  { %v1664_v36 = vmul.bf16 %v2277_v37, %v1542_v20  ;;  %v1665_v39 = vmul.bf16 %v2278_v23, %v1549_v21 }
 0x5db   :  { %v1503_v26 = vpop.permute.xlu1 %1502 }
 0x5dc   :  { %v1680_v35 = vunpack.c.l.bf16 %v1664_v36  ;;  %v1681_v27 = vunpack.c.l.bf16 %v1665_v39  ;;  %v1556_v38 = vrot.slane %v1503_v26, %v2839_v16  ;;  %v1563_v45 = vrot.slane %v1503_v26, %v2842_v17 }
 0x5de   :  { %v1696_v9 = vsel %vm457_vm1, %v1680_v35, 0.0  ;;  %v1703_v48 = vsel %vm457_vm1, %v1681_v27, 0.0  ;;  %v1666_v34 = vmul.bf16 %v2279_v50, %v1556_v38  ;;  %v1667_v12 = vmul.bf16 %v2280_v52, %v1563_v45  ;;  %v2865_v58 = vpop.permute.xlu0 %1383 }
 0x5df   :  { %v1697_v53 = vrot.slane %v1696_v9, 4  ;;  %v1704_v41 = vrot.slane %v1703_v48, 4  ;;  %v1507_v55 = vpop.permute.xlu1 %1506  ;;  %v1441_v33 = vrot.slane %v2865_v58, %v2636_v51 }
 0x5e0   :  { %v1682_v56 = vunpack.c.l.bf16 %v1666_v34  ;;  %v1683_v1 = vunpack.c.l.bf16 %v1667_v12  ;;  %v1570_v24 = vrot.slane %v1507_v55, %v2839_v16  ;;  %v1577_v31 = vrot.slane %v1507_v55, %v2842_v17 }
 0x5e1   :  { %v1698_v60 = vadd.f32 %v1697_v53, %v1696_v9  ;;  %v1705_v43 = vadd.f32 %v1704_v41, %v1703_v48 }
 0x5e2   :  { %v1710_v4 = vsel %vm457_vm1, %v1682_v56, 0.0  ;;  %v1717_v5 = vsel %vm457_vm1, %v1683_v1, 0.0  ;;  %v1668_v44 = vmul.bf16 %v2281_v29, %v1570_v24  ;;  %v1515_v8 = vpop.permute.xlu0 %1514  ;;  %v1669_v63 = vmul.bf16 %v2282_v61, %v1577_v31  ;;  %v2285_v29 = vld [vmem:[%s3037_s0 + $0x18] sm:$0xf] }
 0x5e3   :  { %v1699_v47 = vrot.slane %v1698_v60, 2  ;;  %v1706_v28 = vrot.slane %v1705_v43, 2  ;;  %v1711_v6 = vrot.slane %v1710_v4, 4  ;;  %v1718_v7 = vrot.slane %v1717_v5, 4  ;;  %v1511_v57 = vpop.permute.xlu1 %1510 }
 0x5e4   :  { %v1684_v30 = vunpack.c.l.bf16 %v1668_v44  ;;  %v1598_v54 = vrot.slane %v1515_v8, %v2839_v16  ;;  %v1605_v10 = vrot.slane %v1515_v8, %v2842_v17  ;;  %v1685_v0 = vunpack.c.l.bf16 %v1669_v63 }
 0x5e5   :  { %v1700_v11 = vadd.f32 %v1699_v47, %v1698_v60  ;;  %v1707_v13 = vadd.f32 %v1706_v28, %v1705_v43  ;;  %v1712_v40 = vadd.f32 %v1711_v6, %v1710_v4  ;;  %v1719_v62 = vadd.f32 %v1718_v7, %v1717_v5  ;;  %v2286_v6 = vld [vmem:[%s3037_s0 + $0x1c] sm:$0xf] }
 0x5e6   :  { %v1724_v42 = vsel %vm457_vm1, %v1684_v30, 0.0  ;;  %v1672_v32 = vmul.bf16 %v2283_v2, %v1598_v54  ;;  %v1673_v14 = vmul.bf16 %v2284_v3, %v1605_v10  ;;  %v1519_v22 = vpop.permute.xlu0 %1518  ;;  %v1731_v23 = vsel %vm457_vm1, %v1685_v0, 0.0 }
 0x5e7   :  { %v1701_v15 = vrot.slane %v1700_v11, 1  ;;  %v1708_v19 = vrot.slane %v1707_v13, 1  ;;  %v1713_v20 = vrot.slane %v1712_v40, 2  ;;  %v1720_v21 = vrot.slane %v1719_v62, 2  ;;  %v2892_v37 = vpop.permute.xlu1 %1386 }
 0x5e8   :  { %v1725_v36 = vrot.slane %v1724_v42, 4  ;;  %v1688_v39 = vunpack.c.l.bf16 %v1672_v32  ;;  %v1689_v25 = vunpack.c.l.bf16 %v1673_v14  ;;  %v1732_v45 = vrot.slane %v1731_v23, 4  ;;  %v2287_v32 = vld [vmem:[%s3037_s0 + $0x28] sm:$0xf] }
 0x5e9   :  { %v1702_v49 = vadd.f32 %v1701_v15, %v1700_v11  ;;  %v1709_v26 = vadd.f32 %v1708_v19, %v1707_v13  ;;  %v1714_v35 = vadd.f32 %v1713_v20, %v1712_v40  ;;  %v1721_v27 = vadd.f32 %v1720_v21, %v1719_v62  ;;  %v2288_v20 = vld [vmem:[%s3037_s0 + $0x2c] sm:$0xf] }
 0x5ea   :  { %v1726_v38 = vadd.f32 %v1725_v36, %v1724_v42  ;;  %v1752_v46 = vsel %vm457_vm1, %v1688_v39, 0.0  ;;  %v1759_v9 = vsel %vm457_vm1, %v1689_v25, 0.0  ;;  %v2898_v12 = vpop.permute.xlu0 %1522  ;;  %v1733_v55 = vadd.f32 %v1732_v45, %v1731_v23 }
 0x5eb   :  { %v1824_v48 = vsel %vm918_vm2, %v1709_v26, %v1702_v49  ;;  %v1715_v50 = vrot.slane %v1714_v35, 1  ;;  %v1722_v34 = vrot.slane %v1721_v27, 1  ;;  %v1753_v52 = vrot.slane %v1752_v46, 4  ;;  %v2900_v53 = vpop.permute.xlu1 %1389 }
 0x5ec   :  { %v1727_v41 = vrot.slane %v1726_v38, 2  ;;  %v1760_v18 = vrot.slane %v1759_v9, 4  ;;  %v1584_v56 = vrot.slane %v1511_v57, %v2839_v16  ;;  %v1591_v43 = vrot.slane %v1511_v57, %v2842_v17 }
 0x5ed   :  { %v1716_v1 = vadd.f32 %v1715_v50, %v1714_v35  ;;  %v1723_v24 = vadd.f32 %v1722_v34, %v1721_v27  ;;  %v1754_v60 = vadd.f32 %v1753_v52, %v1752_v46  ;;  %v1734_v4 = vrot.slane %v1733_v55, 2 }
 0x5ee   :  { %v1728_v31 = vadd.f32 %v1727_v41, %v1726_v38  ;;  %v1761_v5 = vadd.f32 %v1760_v18, %v1759_v9  ;;  %v1670_v44 = vmul.bf16 %v2285_v29, %v1584_v56  ;;  %v1671_v7 = vmul.bf16 %v2286_v6, %v1591_v43  ;;  %v2912_v61 = vpop.permute.xlu0 %1526  ;;  %v2289_v43 = vld [vmem:[%s3037_s0 + $0x30] sm:$0xf] }
 0x5ef   :  { %v1825_v47 = vsel %vm920_vm3, %v1716_v1, %v1824_v48  ;;  %v1755_v28 = vrot.slane %v1754_v60, 2  ;;  %v1612_v8 = vrot.slane %v1519_v22, %v2839_v16  ;;  %v2914_v57 = vpop.permute.xlu1 %1392  ;;  %v1735_v54 = vadd.f32 %v1734_v4, %v1733_v55 }
 0x5f0   :  { %v1826_v63 = vsel %vm922_vm4, %v1723_v24, %v1825_v47  ;;  %v1729_v30 = vrot.slane %v1728_v31, 1  ;;  %v1762_v10 = vrot.slane %v1761_v5, 2  ;;  %v1686_v13 = vunpack.c.l.bf16 %v1670_v44 }
 0x5f1   :  { %v1756_v11 = vadd.f32 %v1755_v28, %v1754_v60  ;;  %v1687_v40 = vunpack.c.l.bf16 %v1671_v7  ;;  %v1619_v62 = vrot.slane %v1519_v22, %v2842_v17  ;;  %v1736_v42 = vrot.slane %v1735_v54, 1 }
 0x5f2   :  { %v1730_v0 = vadd.f32 %v1729_v30, %v1728_v31  ;;  %v1763_v2 = vadd.f32 %v1762_v10, %v1761_v5  ;;  %v1674_v3 = vmul.bf16 %v2287_v32, %v1612_v8  ;;  %v1738_v15 = vsel %vm457_vm1, %v1686_v13, 0.0  ;;  %v2926_v36 = vpop.permute.xlu0 %1368 }
 0x5f3   :  { %v1757_v14 = vrot.slane %v1756_v11, 1  ;;  %v1745_v19 = vsel %vm457_vm1, %v1687_v40, 0.0  ;;  %v1675_v21 = vmul.bf16 %v2288_v20, %v1619_v62  ;;  %v2928_v22 = vadd.f32 %v1736_v42, %v1735_v54  ;;  %v2933_v38 = vpop.permute.xlu1 %1395 }
 0x5f4   :  { %v2931_v23 = vsel %vm924_vm5, %v1730_v0, %v1826_v63  ;;  %v1764_v39 = vrot.slane %v1763_v2, 1  ;;  %v1739_v25 = vrot.slane %v1738_v15, 4  ;;  %v1746_v26 = vrot.slane %v1745_v19, 4 }
 0x5f5   :  { %v1758_v49 = vadd.f32 %v1757_v14, %v1756_v11  ;;  %v1690_v35 = vunpack.c.l.bf16 %v1674_v3  ;;  %v1691_v27 = vunpack.c.l.bf16 %v1675_v21  ;;  %v1445_v9 = vrot.slane %v2892_v37, %v2636_v51  ;;  %v2291_v3 = vld [vmem:[%s3037_s0 + $0x38] sm:$0xf] }
 0x5f6   :  { %v1765_v45 = vadd.f32 %v1764_v39, %v1763_v2  ;;  %v1740_v46 = vadd.f32 %v1739_v25, %v1738_v15  ;;  %v1626_v48 = vrot.slane %v2898_v12, %v2839_v16  ;;  %v1747_v50 = vadd.f32 %v1746_v26, %v1745_v19  ;;  %v2943_v55 = vpop.permute.xlu0 %1371  ;;  %v2292_v15 = vld [vmem:[%s3037_s0 + $0x3c] sm:$0xf] }
 0x5f7   :  { %v1766_v34 = vsel %vm457_vm1, %v1690_v35, 0.0  ;;  %v1773_v52 = vsel %vm457_vm1, %v1691_v27, 0.0  ;;  %v1633_v41 = vrot.slane %v2898_v12, %v2842_v17  ;;  %v1477_v37 = vsel %vm918_vm2, %v1445_v9, %v1441_v33  ;;  %v2290_v12 = vld [vmem:[%s3037_s0 + $0x34] sm:$0xf]  ;;  %v1399_v7 = vpop.permute.xlu1 %1398 }
 0x5f8   :  { %v1831_v18 = vsel %vm918_vm2, %v1765_v45, %v1758_v49  ;;  %v1741_v56 = vrot.slane %v1740_v46, 2  ;;  %v1767_v1 = vrot.slane %v1766_v34, 4  ;;  %v1774_v24 = vrot.slane %v1773_v52, 4 }
 0x5f9   :  { %v1748_v60 = vrot.slane %v1747_v50, 2  ;;  %v1676_v31 = vmul.bf16 %v2289_v43, %v1626_v48  ;;  %v1677_v4 = vmul.bf16 %v2290_v12, %v1633_v41  ;;  %v1449_v47 = vrot.slane %v2900_v53, %v2636_v51 }
 0x5fa   :  { %v1742_v5 = vadd.f32 %v1741_v56, %v1740_v46  ;;  %v1768_v29 = vadd.f32 %v1767_v1, %v1766_v34  ;;  %v1775_v44 = vadd.f32 %v1774_v24, %v1773_v52  ;;  %v1640_v33 = vrot.slane %v2912_v61, %v2839_v16  ;;  %v1375_v10 = vpop.permute.xlu0 %1374 }
 0x5fb   :  { %v1749_v28 = vadd.f32 %v1748_v60, %v1747_v50  ;;  %v1692_v58 = vunpack.c.l.bf16 %v1676_v31  ;;  %v1693_v6 = vunpack.c.l.bf16 %v1677_v4  ;;  %v1478_v54 = vsel %vm920_vm3, %v1449_v47, %v1477_v37  ;;  %v1402_v35 = vpop.permute.xlu1 %1401 }
 0x5fc   :  { %v1743_v8 = vrot.slane %v1742_v5, 1  ;;  %v1769_v63 = vrot.slane %v1768_v29, 2  ;;  %v1776_v30 = vrot.slane %v1775_v44, 2  ;;  %v1647_v53 = vrot.slane %v2912_v61, %v2842_v17 }
 0x5fd   :  { %v1750_v11 = vrot.slane %v1749_v28, 1  ;;  %v1780_v13 = vsel %vm457_vm1, %v1692_v58, 0.0  ;;  %v1787_v40 = vsel %vm457_vm1, %v1693_v6, 0.0  ;;  %v1678_v14 = vmul.bf16 %v2291_v3, %v1640_v33 }
 0x5fe   :  { %v2965_v62 = vadd.f32 %v1743_v8, %v1742_v5  ;;  %v1770_v0 = vadd.f32 %v1769_v63, %v1768_v29  ;;  %v1777_v42 = vadd.f32 %v1776_v30, %v1775_v44  ;;  %v1781_v16 = vrot.slane %v1780_v13, 4  ;;  %v1378_v48 = vpop.permute.xlu0 %1377 }
 0x5ff   :  { %v2967_v2 = vadd.f32 %v1750_v11, %v1749_v28  ;;  %v1788_v32 = vrot.slane %v1787_v40, 4  ;;  %v1679_v19 = vmul.bf16 %v2292_v15, %v1647_v53  ;;  %v1453_v21 = vrot.slane %v2914_v57, %v2636_v51  ;;  %v1405_v47 = vpop.permute.xlu1 %1404 }
 0x600   :  { %v1771_v20 = vrot.slane %v1770_v0, 1  ;;  %v1778_v17 = vrot.slane %v1777_v42, 1  ;;  %v1782_v61 = vadd.f32 %v1781_v16, %v1780_v13  ;;  %v1694_v25 = vunpack.c.l.bf16 %v1678_v14 }
 0x601   :  { %v1789_v39 = vadd.f32 %v1788_v32, %v1787_v40  ;;  %v1695_v49 = vunpack.c.l.bf16 %v1679_v19  ;;  %v1421_v26 = vrot.slane %v2926_v36, %v2636_v51  ;;  %v1479_v9 = vsel %vm922_vm4, %v1453_v21, %v1478_v54 }
 0x602   :  { %v1772_v27 = vadd.f32 %v1771_v20, %v1770_v0  ;;  %v1779_v45 = vadd.f32 %v1778_v17, %v1777_v42  ;;  %v1783_v46 = vrot.slane %v1782_v61, 2  ;;  %v1794_v34 = vsel %vm457_vm1, %v1694_v25, 0.0  ;;  %v1381_v33 = vpop.permute.xlu0 %1380 }
 0x603   :  { %v1790_v50 = vrot.slane %v1789_v39, 2  ;;  %v1801_v52 = vsel %vm457_vm1, %v1695_v49, 0.0  ;;  %v1472_v57 = vsel %vm922_vm4, %v1421_v26, %v2870_v59  ;;  %v1795_v1 = vrot.slane %v1794_v34, 4 }
 0x604   :  { %v1832_v41 = vsel %vm920_vm3, %v1772_v27, %v1831_v18  ;;  %v1784_v56 = vadd.f32 %v1783_v46, %v1782_v61  ;;  %v1802_v36 = vrot.slane %v1801_v52, 4  ;;  %v1457_v37 = vrot.slane %v2933_v38, %v2636_v51 }
 0x605   :  { %v1833_v24 = vsel %vm922_vm4, %v1779_v45, %v1832_v41  ;;  %v1791_v60 = vadd.f32 %v1790_v50, %v1789_v39  ;;  %v1425_v43 = vrot.slane %v2943_v55, %v2636_v51  ;;  %v1796_v12 = vadd.f32 %v1795_v1, %v1794_v34 }
 0x606   :  { %v1785_v31 = vrot.slane %v1784_v56, 1  ;;  %v1803_v4 = vadd.f32 %v1802_v36, %v1801_v52  ;;  %v1461_v5 = vrot.slane %v1399_v7, %v2636_v51  ;;  %v1480_v18 = vsel %vm924_vm5, %v1457_v37, %v1479_v9 }
 0x607   :  { %v1792_v59 = vrot.slane %v1791_v60, 1  ;;  %v1473_v29 = vsel %vm924_vm5, %v1425_v43, %v1472_v57  ;;  %v1429_v44 = vrot.slane %v1375_v10, %v2636_v51  ;;  %v1797_v58 = vrot.slane %v1796_v12, 2 }
 0x608   :  { %v1786_v28 = vadd.f32 %v1785_v31, %v1784_v56  ;;  %v1804_v6 = vrot.slane %v1803_v4, 2  ;;  %v1481_v38 = vsel %vm926_vm6, %v1461_v5, %v1480_v18  ;;  %v1465_v63 = vrot.slane %v1402_v35, %v2636_v51 }
 0x609   :  { %v1793_v55 = vadd.f32 %v1792_v59, %v1791_v60  ;;  %v1474_v8 = vsel %vm926_vm6, %v1429_v44, %v1473_v29  ;;  %v1433_v7 = vrot.slane %v1378_v48, %v2636_v51  ;;  %v1798_v54 = vadd.f32 %v1797_v58, %v1796_v12 }
 0x60a   :  { %v1834_v30 = vsel %vm924_vm5, %v1786_v28, %v1833_v24  ;;  %v1805_v11 = vadd.f32 %v1804_v6, %v1803_v4  ;;  %v1469_v10 = vrot.slane %v1405_v47, %v2636_v51  ;;  %v1482_v13 = vsel %vm928_vm7, %v1465_v63, %v1481_v38 }
 0x60b   :  { %v1475_v40 = vsel %vm928_vm7, %v1433_v7, %v1474_v8  ;;  %v1437_v53 = vrot.slane %v1381_v33, %v2636_v51  ;;  %v1828_v0 = vsel %vm926_vm6, %v2928_v22, %v2931_v23  ;;  %v1799_v42 = vrot.slane %v1798_v54, 1 }
 0x60c   :  { %v1806_v16 = vrot.slane %v1805_v11, 1  ;;  %v1483_v32 = vsel %vm930_vm8, %v1469_v10, %v1482_v13  ;;  %v1829_v3 = vsel %vm928_vm7, %v2965_v62, %v1828_v0  ;;  %v1835_v62 = vsel %vm926_vm6, %v1793_v55, %v1834_v30 }
 0x60d   :  { %1487 = vst.msk [vmem:[%s3045_s8 + $0x8] sm:$0xff] %vm941_vm9, %v1483_v32  ;;  %v1476_v14 = vsel %vm930_vm8, %v1437_v53, %v1475_v40  ;;  %v1830_v51 = vsel %vm930_vm8, %v2967_v2, %v1829_v3  ;;  %v1800_v22 = vadd.f32 %v1799_v42, %v1798_v54 }
 0x60e   :  { %v1807_v23 = vadd.f32 %v1806_v16, %v1805_v11  ;;  %1486 = vst.msk [vmem:[%s3045_s8] sm:$0xff] %vm941_vm9, %v1476_v14 }
 0x60f   :  { %1840 = vst.msk [vmem:[#allocation2] sm:$0xff] %vm457_vm1, %v1830_v51  ;;  %v1836_v15 = vsel %vm928_vm7, %v1800_v22, %v1835_v62 }
 0x610   :  { %v1837_v19 = vsel %vm930_vm8, %v1807_v23, %v1836_v15 }
 0x611   :  { %1841 = vst.msk [vmem:[#allocation2 + $0x8] sm:$0xff] %vm457_vm1, %v1837_v19 }
 0x612   :  { %2304 = shalt.err (!%p2301_p4)
}
 0x613   :  { %s2305_s19 = scalar_lea.hbm %s3044_s7, 256 }
 0x614   :  { %p2306_p5 = scmp.ne.s32.totalorder %s3044_s7, %s2305_s19  ;;  %p2309_p6 = scmp.lt.u32.totalorder %s2305_s19, %s3044_s7 }
 0x616   :  { %p2311_p7 = pnand %p2309_p6, %p2306_p5 }
 0x618   :  { %2314 = shalt.err (!%p2311_p7)
}
 0x619   :  { %s2321_s23 = smov 128   ;;  %s2322_s24 = smov 8  }
 0x61a   :  { %1853 = dma.vmem_to_hbm [thread:$0]  %s1848_s14, 256, %s3044_s7, [#allocation3], %s2321_s23, %s2321_s23, %s2322_s24  }
 0x61b   :  { %2315 = dma.done.wait [#allocation3], 256  }
 0x61c   :  { %2316 = vsyncadd [#allocation3], 4294967040 }
 0x61d   :  { %1861 = vsyncpa [#allocation3], 1 }

</bundles_post_ra>
